<compile_context>
chip_gen: v7x
topology: tpu7x:2x2x1
jax: 0.10.0
libtpu: 0.0.40
codegen_flags: <defaults>
</compile_context>

<pallas_src>
import math

import jax
import jax.numpy as jnp
import numpy as np
from jax import lax
from jax.experimental import pallas as pl
from jax.experimental.pallas import tpu as pltpu

# ---- model hyper-parameters (small, consistent with the module) ----
B = 2           # batch
S = 8           # seq_len
SB = B * S      # rows in the activation slab (seq-major: row = t*B + b)
D = 32          # dim_model
H = 4           # heads_en
HD = D // H     # head dim
TOTAL_EX, TOTAL_CAT, TOTAL_IN = 50, 30, 10
EPS = 1e-5      # nn.LayerNorm default

# ---- packed weight slab: row offsets (all rows padded to 4*D = 128 lanes) ----
R_WQKV = 0                  # (D, 3D)  fused q/k/v projection (transposed)
R_WO = R_WQKV + D           # (D, D)   attention out-proj (transposed)
R_WIH = R_WO + D            # (D, 4D)  LSTM weight_ih (transposed)
R_WHH = R_WIH + D           # (D, 4D)  LSTM weight_hh (transposed)
R_W1 = R_WHH + D            # (D, D)   FFN layer1 (transposed)
R_W2 = R_W1 + D             # (D, D)   FFN layer2 (transposed)
R_MASK = R_W2 + D           # (D, H)   head block mask
R_MASKT = R_MASK + D        # (H, D)   transposed head block mask
R_GT = R_MASKT + H          # (SB, B)  seq-broadcast selector (Gt[t*B+b, b] = 1)
R_G = R_GT + SB             # (B, SB)  per-batch group-reduce selector
R_WOUT = R_G + B            # (1, D)   output head weight as a row vector
R_LN1W = R_WOUT + 1
R_LN1B = R_LN1W + 1
R_BQKV = R_LN1B + 1         # (1, 3D)
R_BO = R_BQKV + 1
R_BIH = R_BO + 1            # (1, 4D)
R_BHH = R_BIH + 1           # (1, 4D)
R_LN2W = R_BHH + 1
R_LN2B = R_LN2W + 1
R_B1 = R_LN2B + 1
R_B2 = R_B1 + 1
R_BOUT = R_B2 + 1           # (1, 1)
SLAB_ROWS = ((R_BOUT + 1 + 7) // 8) * 8   # 264 (multiple of 8)
SLAB_COLS = 4 * D                          # 128


def _layer_norm(x, w, b):
    mu = jnp.mean(x, axis=-1, keepdims=True)
    var = jnp.mean((x - mu) ** 2, axis=-1, keepdims=True)
    return (x - mu) * lax.rsqrt(var + EPS) * w + b


# --------------------------- Pallas kernel ---------------------------
def lqm_kernel(x_ref, w_ref, o_ref):
    # x_ref: (SB, D) seq-major activations (row t*B + b).
    # w_ref: (SLAB_ROWS, 128) packed weights/constants.
    # o_ref: (1, SB) lane-dense logits (lane t*B + b).
    x = x_ref[...]                                              # (SB, D)

    # ---- load all weights once (static slices of the packed slab) ----
    wqkv = w_ref[R_WQKV:R_WQKV + D, 0:3 * D]                    # (D, 3D)
    wo = w_ref[R_WO:R_WO + D, 0:D]                              # (D, D)
    w_ih = w_ref[R_WIH:R_WIH + D, 0:4 * D]                      # (D, 4D)
    w_hh = w_ref[R_WHH:R_WHH + D, 0:4 * D]                      # (D, 4D)
    w1 = w_ref[R_W1:R_W1 + D, 0:D]
    w2 = w_ref[R_W2:R_W2 + D, 0:D]
    hmask = w_ref[R_MASK:R_MASK + D, 0:H]                       # (D, H)
    hmask_t = w_ref[R_MASKT:R_MASKT + H, 0:D]                   # (H, D)
    gt = w_ref[R_GT:R_GT + SB, 0:B]                             # (SB, B)
    gsel = w_ref[R_G:R_G + B, 0:SB]                             # (B, SB)
    w_out_t = w_ref[R_WOUT:R_WOUT + 1, 0:D]                     # (1, D)
    ln1_w = w_ref[R_LN1W:R_LN1W + 1, 0:D]
    ln1_b = w_ref[R_LN1B:R_LN1B + 1, 0:D]
    bqkv = w_ref[R_BQKV:R_BQKV + 1, 0:3 * D]
    bo = w_ref[R_BO:R_BO + 1, 0:D]
    b_ih = w_ref[R_BIH:R_BIH + 1, 0:4 * D]
    b_hh = w_ref[R_BHH:R_BHH + 1, 0:4 * D]
    ln2_w = w_ref[R_LN2W:R_LN2W + 1, 0:D]
    ln2_b = w_ref[R_LN2B:R_LN2B + 1, 0:D]
    b1 = w_ref[R_B1:R_B1 + 1, 0:D]
    b2 = w_ref[R_B2:R_B2 + 1, 0:D]
    b_out = w_ref[R_BOUT:R_BOUT + 1, 0:1]

    # ---- LayerNorm 1 (row-wise over all SB rows) ----
    h1 = _layer_norm(x, ln1_w, ln1_b)                           # (SB, D)

    # ---- fused QKV projection ----
    qkv = jnp.dot(h1, wqkv, preferred_element_type=jnp.float32) + bqkv   # (SB, 3D)
    k = qkv[:, D:2 * D]                                         # (SB, D)
    v = qkv[:, 2 * D:3 * D]                                     # (SB, D)
    q_last = qkv[(S - 1) * B:S * B, 0:D]                        # (B, D) last time step (contiguous)

    # ---- last-query multi-head attention, batch + head vectorized ----
    # broadcast the per-batch last query to every (t, b) row via the selector matmul
    q_full = jnp.dot(gt, q_last, preferred_element_type=jnp.float32)     # (SB, D)
    scale = 1.0 / math.sqrt(HD)
    scores = jnp.dot(q_full * k, hmask,
                     preferred_element_type=jnp.float32) * scale         # (SB, H)
    m = jnp.max(scores, axis=1, keepdims=True)
    m = jnp.max(m, axis=0, keepdims=True)                       # (1, 1) global shift (softmax-safe)
    e = jnp.exp(scores - m)                                     # (SB, H)
    denom = jnp.dot(gsel, e, preferred_element_type=jnp.float32)          # (B, H) per-(batch, head) sums
    denom_full = jnp.dot(gt, denom, preferred_element_type=jnp.float32)   # (SB, H)
    wts = e / denom_full                                        # softmax over S per (batch, head)
    w_full = jnp.dot(wts, hmask_t, preferred_element_type=jnp.float32)    # (SB, D) per-lane weights
    ctx = jnp.dot(gsel, w_full * v, preferred_element_type=jnp.float32)   # (B, D) weighted sum over S
    attn = jnp.dot(ctx, wo, preferred_element_type=jnp.float32) + bo      # (B, D)
    # TODO(synk): embedding/attention dropout (p=0.1) implemented as identity (eval behavior).

    # ---- residual: batch b's attention row broadcast over its S rows ----
    out = h1 + jnp.dot(gt, attn, preferred_element_type=jnp.float32)      # (SB, D)

    # ---- LSTM (1 layer, hidden = D), fully unrolled, (B, D) carry in vregs ----
    xproj = jnp.dot(out, w_ih, preferred_element_type=jnp.float32) + b_ih  # (SB, 4D)
    h = jnp.zeros((B, D), jnp.float32)
    c = jnp.zeros((B, D), jnp.float32)
    step_hs = []
    for t in range(S):                                          # static unroll, contiguous slices
        gates = (xproj[t * B:(t + 1) * B, :]
                 + jnp.dot(h, w_hh, preferred_element_type=jnp.float32) + b_hh)  # (B, 4D)
        i_g = jax.nn.sigmoid(gates[:, 0:D])
        f_g = jax.nn.sigmoid(gates[:, D:2 * D])
        g_g = jnp.tanh(gates[:, 2 * D:3 * D])
        o_g = jax.nn.sigmoid(gates[:, 3 * D:4 * D])
        c = f_g * c + i_g * g_g
        h = o_g * jnp.tanh(c)
        step_hs.append(h)
    lstm_out = jnp.concatenate(step_hs, axis=0)                 # (SB, D), already seq-major order

    # ---- LayerNorm 2 ----
    h2 = _layer_norm(lstm_out, ln2_w, ln2_b)                    # (SB, D)

    # ---- Feed-forward block + residual ----
    f1 = jnp.maximum(jnp.dot(h2, w1, preferred_element_type=jnp.float32) + b1, 0.0)
    f2 = jnp.dot(f1, w2, preferred_element_type=jnp.float32) + b2
    y = f2 + h2                                                 # (SB, D)

    # ---- output head, lane-dense (1, SB): lane t*B + b holds logit (b, t) ----
    logits = jnp.dot(w_out_t, y.T, preferred_element_type=jnp.float32) + b_out   # (1, SB)
    o_ref[...] = logits


# ----------------------------- weight packing (host, once) -----------------------------
def pack_weights(p):
    def row_block(a):
        a = np.asarray(a, np.float32)
        out = np.zeros((a.shape[0], SLAB_COLS), np.float32)
        out[:, :a.shape[1]] = a
        return out

    hmask = np.zeros((D, H), np.float32)
    for hh in range(H):
        hmask[hh * HD:(hh + 1) * HD, hh] = 1.0
    gsel = np.tile(np.eye(B, dtype=np.float32), (1, S))          # (B, SB): gsel[b, t*B+b] = 1
    gt = gsel.T                                                  # (SB, B)

    blocks = [
        row_block(np.concatenate([np.asarray(p["wq_t"]), np.asarray(p["wk_t"]),
                                  np.asarray(p["wv_t"])], axis=1)),          # R_WQKV
        row_block(p["wo_t"]),                                                 # R_WO
        row_block(p["w_ih_t"]),                                               # R_WIH
        row_block(p["w_hh_t"]),                                               # R_WHH
        row_block(p["w1_t"]),                                                 # R_W1
        row_block(p["w2_t"]),                                                 # R_W2
        row_block(hmask),                                                     # R_MASK
        row_block(hmask.T),                                                   # R_MASKT
        row_block(gt),                                                        # R_GT
        row_block(gsel),                                                      # R_G
        row_block(np.asarray(p["w_out"]).T),                                  # R_WOUT
        row_block(p["ln1_w"]), row_block(p["ln1_b"]),
        row_block(np.concatenate([np.asarray(p["bq"]), np.asarray(p["bk"]),
                                  np.asarray(p["bv"])], axis=1)),             # R_BQKV
        row_block(p["bo"]),
        row_block(p["b_ih"]), row_block(p["b_hh"]),
        row_block(p["ln2_w"]), row_block(p["ln2_b"]),
        row_block(p["b1"]), row_block(p["b2"]),
        row_block(p["b_out"]),
    ]
    slab = np.concatenate(blocks, axis=0)
    slab = np.pad(slab, ((0, SLAB_ROWS - slab.shape[0]), (0, 0)))
    return jnp.asarray(slab)


# ----------------------------- wrapper ------------------------------
def last_query_model_forward(params, in_ex, in_cat, in_in, labels=None):
    # Embedding lookups + sum (glue in plain JAX).
    x = (jnp.take(params["emb_ex"], in_ex, axis=0)
         + jnp.take(params["emb_cat"], in_cat, axis=0)
         + jnp.take(params["emb_in"], in_in, axis=0)).astype(jnp.float32)   # (B, S, D)
    bsz, seq, d = x.shape
    x_seq = jnp.transpose(x, (1, 0, 2)).reshape(seq * bsz, d)               # seq-major rows t*B + b

    wslab = params.get("wslab")
    if wslab is None:
        wslab = pack_weights(params)                                        # (SLAB_ROWS, 128)

    out = pl.pallas_call(
        lqm_kernel,
        out_shape=jax.ShapeDtypeStruct((1, seq * bsz), jnp.float32),
        grid=(1,),
        in_specs=[pl.BlockSpec((seq * bsz, d), lambda i: (0, 0)),
                  pl.BlockSpec((SLAB_ROWS, SLAB_COLS), lambda i: (0, 0))],
        out_specs=pl.BlockSpec((1, seq * bsz), lambda i: (0, 0)),
        compiler_params=pltpu.CompilerParams(dimension_semantics=("arbitrary",)),
    )(x_seq, wslab)
    logits = out.reshape(seq, bsz).T                                        # (B, S)
    return logits, 0


# ------------------------ deterministic params -----------------------
def init_params(key):
    keys = jax.random.split(key, 20)

    def n(k, shape, scale=0.1):
        return (scale * jax.random.normal(k, shape)).astype(jnp.float32)

    p = {}
    p["emb_ex"] = n(keys[0], (TOTAL_EX, D))
    p["emb_cat"] = n(keys[1], (TOTAL_CAT, D))
    p["emb_in"] = n(keys[2], (TOTAL_IN, D))
    p["ln1_w"] = jnp.ones((1, D), jnp.float32)
    p["ln1_b"] = jnp.zeros((1, D), jnp.float32)
    in_proj_w = n(keys[3], (3 * D, D))               # torch MHA in_proj_weight
    in_proj_b = n(keys[4], (1, 3 * D))
    p["wq_t"] = in_proj_w[0:D].T
    p["wk_t"] = in_proj_w[D:2 * D].T
    p["wv_t"] = in_proj_w[2 * D:3 * D].T
    p["bq"] = in_proj_b[:, 0:D]
    p["bk"] = in_proj_b[:, D:2 * D]
    p["bv"] = in_proj_b[:, 2 * D:3 * D]
    p["wo_t"] = n(keys[5], (D, D)).T                 # out_proj
    p["bo"] = n(keys[6], (1, D))
    p["w_ih_t"] = n(keys[7], (4 * D, D)).T           # LSTM weight_ih_l0 (transposed)
    p["w_hh_t"] = n(keys[8], (4 * D, D)).T           # LSTM weight_hh_l0 (transposed)
    p["b_ih"] = n(keys[9], (1, 4 * D))
    p["b_hh"] = n(keys[10], (1, 4 * D))
    p["ln2_w"] = jnp.ones((1, D), jnp.float32)
    p["ln2_b"] = jnp.zeros((1, D), jnp.float32)
    p["w1_t"] = n(keys[11], (D, D)).T                # FFN layer1
    p["b1"] = n(keys[12], (1, D))
    p["w2_t"] = n(keys[13], (D, D)).T                # FFN layer2
    p["b2"] = n(keys[14], (1, D))
    p["w_out"] = n(keys[15], (1, D)).T               # out head -> (D, 1)
    p["b_out"] = n(keys[16], (1, 1))
    return p


# --------------------------- JAX reference ---------------------------
def ref_forward(p, in_ex, in_cat, in_in):
    x = (jnp.take(p["emb_ex"], in_ex, axis=0)
         + jnp.take(p["emb_cat"], in_cat, axis=0)
         + jnp.take(p["emb_in"], in_in, axis=0)).astype(jnp.float32)
    b, s, d = x.shape
    hd = d // H

    h1 = _layer_norm(x, p["ln1_w"], p["ln1_b"])
    q = h1[:, -1:, :] @ p["wq_t"] + p["bq"]
    k = h1 @ p["wk_t"] + p["bk"]
    v = h1 @ p["wv_t"] + p["bv"]
    qh = q.reshape(b, 1, H, hd)
    kh = k.reshape(b, s, H, hd)
    vh = v.reshape(b, s, H, hd)
    sc = jnp.einsum("bqhd,bkhd->bhqk", qh, kh) / math.sqrt(hd)
    w = jax.nn.softmax(sc, axis=-1)
    ctx = jnp.einsum("bhqk,bkhd->bqhd", w, vh).reshape(b, 1, d)
    attn = ctx @ p["wo_t"] + p["bo"]
    out = attn + h1

    xp = out @ p["w_ih_t"] + p["b_ih"]               # (B, S, 4D)

    def step(carry, xpt):
        h, c = carry
        g = xpt + h @ p["w_hh_t"] + p["b_hh"]
        i_g = jax.nn.sigmoid(g[..., :d])
        f_g = jax.nn.sigmoid(g[..., d:2 * d])
        g_g = jnp.tanh(g[..., 2 * d:3 * d])
        o_g = jax.nn.sigmoid(g[..., 3 * d:])
        c = f_g * c + i_g * g_g
        h = o_g * jnp.tanh(c)
        return (h, c), h

    (_, _), ys = lax.scan(step,
                          (jnp.zeros((b, d), jnp.float32), jnp.zeros((b, d), jnp.float32)),
                          jnp.swapaxes(xp, 0, 1))
    lstm_out = jnp.swapaxes(ys, 0, 1)

    h2 = _layer_norm(lstm_out, p["ln2_w"], p["ln2_b"])
    f1 = jnp.maximum(h2 @ p["w1_t"] + p["b1"], 0.0)
    f2 = f1 @ p["w2_t"] + p["b2"]
    y = f2 + h2
    logits = y @ p["w_out"] + p["b_out"]
    return logits[..., 0]


if __name__ == "__main__":
    key = jax.random.PRNGKey(0)
    pk, k1, k2, k3 = jax.random.split(key, 4)
    params = init_params(pk)
    params["wslab"] = pack_weights(params)           # pack ONCE on host

    in_ex = jax.random.randint(k1, (B, S), 0, TOTAL_EX, dtype=jnp.int32)
    in_cat = jax.random.randint(k2, (B, S), 0, TOTAL_CAT, dtype=jnp.int32)
    in_in = jax.random.randint(k3, (B, S), 0, TOTAL_IN, dtype=jnp.int32)
    labels = jnp.zeros((B, S), jnp.float32)          # unused (matches torch signature)

    out, _aux = last_query_model_forward(params, in_ex, in_cat, in_in, labels)
    out = jax.block_until_ready(out)

    ref = ref_forward(params, in_ex, in_cat, in_in)
    np.testing.assert_allclose(np.asarray(out), np.asarray(ref), rtol=2e-2, atol=2e-2)
    assert out.shape == (B, S)
    print("KERNEL_OK")
</pallas_src>

<mosaic_0001>
module attributes {stable_mosaic.version = 11 : i64} {
  func.func @lqm_kernel(%arg0: i32, %arg1: memref<16x32xf32, #tpu.memory_space<vmem>>, %arg2: memref<264x128xf32, #tpu.memory_space<vmem>>, %arg3: memref<1x16xf32, #tpu.memory_space<vmem>>) attributes {dimension_semantics = [#tpu.dimension_semantics<arbitrary>], iteration_bounds = array<i64: 1>, scalar_prefetch = 0 : i64, scratch_operands = 0 : i64, tpu.core_type = #tpu.core_type<tc>, window_params = [{pipeline_mode = #tpu.pipeline_mode<synchronous>, transform_indices = @transform_0, window_bounds = array<i64: 16, 32>}, {pipeline_mode = #tpu.pipeline_mode<synchronous>, transform_indices = @transform_1, window_bounds = array<i64: 264, 128>}, {pipeline_mode = #tpu.pipeline_mode<synchronous>, transform_indices = @transform_2, window_bounds = array<i64: 1, 16>}]} {
    %c0 = arith.constant 0 : index
    %c0_0 = arith.constant 0 : index
    %0 = vector.load %arg1[%c0, %c0_0] : memref<16x32xf32, #tpu.memory_space<vmem>>, vector<16x32xf32>
    %c0_1 = arith.constant 0 : index
    %c0_2 = arith.constant 0 : index
    %1 = vector.load %arg2[%c0_1, %c0_2] : memref<264x128xf32, #tpu.memory_space<vmem>>, vector<32x96xf32>
    %c32 = arith.constant 32 : index
    %c0_3 = arith.constant 0 : index
    %2 = vector.load %arg2[%c32, %c0_3] : memref<264x128xf32, #tpu.memory_space<vmem>>, vector<32x32xf32>
    %c64 = arith.constant 64 : index
    %c0_4 = arith.constant 0 : index
    %3 = vector.load %arg2[%c64, %c0_4] : memref<264x128xf32, #tpu.memory_space<vmem>>, vector<32x128xf32>
    %c96 = arith.constant 96 : index
    %c0_5 = arith.constant 0 : index
    %4 = vector.load %arg2[%c96, %c0_5] : memref<264x128xf32, #tpu.memory_space<vmem>>, vector<32x128xf32>
    %c128 = arith.constant 128 : index
    %c0_6 = arith.constant 0 : index
    %5 = vector.load %arg2[%c128, %c0_6] : memref<264x128xf32, #tpu.memory_space<vmem>>, vector<32x32xf32>
    %c160 = arith.constant 160 : index
    %c0_7 = arith.constant 0 : index
    %6 = vector.load %arg2[%c160, %c0_7] : memref<264x128xf32, #tpu.memory_space<vmem>>, vector<32x32xf32>
    %c192 = arith.constant 192 : index
    %c0_8 = arith.constant 0 : index
    %7 = vector.load %arg2[%c192, %c0_8] : memref<264x128xf32, #tpu.memory_space<vmem>>, vector<32x4xf32>
    %c224 = arith.constant 224 : index
    %c0_9 = arith.constant 0 : index
    %8 = vector.load %arg2[%c224, %c0_9] : memref<264x128xf32, #tpu.memory_space<vmem>>, vector<4x32xf32>
    %c228 = arith.constant 228 : index
    %c0_10 = arith.constant 0 : index
    %9 = vector.load %arg2[%c228, %c0_10] : memref<264x128xf32, #tpu.memory_space<vmem>>, vector<16x2xf32>
    %c244 = arith.constant 244 : index
    %c0_11 = arith.constant 0 : index
    %10 = vector.load %arg2[%c244, %c0_11] : memref<264x128xf32, #tpu.memory_space<vmem>>, vector<2x16xf32>
    %c246 = arith.constant 246 : index
    %c0_12 = arith.constant 0 : index
    %11 = vector.load %arg2[%c246, %c0_12] : memref<264x128xf32, #tpu.memory_space<vmem>>, vector<1x32xf32>
    %c247 = arith.constant 247 : index
    %c0_13 = arith.constant 0 : index
    %12 = vector.load %arg2[%c247, %c0_13] : memref<264x128xf32, #tpu.memory_space<vmem>>, vector<1x32xf32>
    %c248 = arith.constant 248 : index
    %c0_14 = arith.constant 0 : index
    %13 = vector.load %arg2[%c248, %c0_14] : memref<264x128xf32, #tpu.memory_space<vmem>>, vector<1x32xf32>
    %c249 = arith.constant 249 : index
    %c0_15 = arith.constant 0 : index
    %14 = vector.load %arg2[%c249, %c0_15] : memref<264x128xf32, #tpu.memory_space<vmem>>, vector<1x96xf32>
    %c250 = arith.constant 250 : index
    %c0_16 = arith.constant 0 : index
    %15 = vector.load %arg2[%c250, %c0_16] : memref<264x128xf32, #tpu.memory_space<vmem>>, vector<1x32xf32>
    %c251 = arith.constant 251 : index
    %c0_17 = arith.constant 0 : index
    %16 = vector.load %arg2[%c251, %c0_17] : memref<264x128xf32, #tpu.memory_space<vmem>>, vector<1x128xf32>
    %c252 = arith.constant 252 : index
    %c0_18 = arith.constant 0 : index
    %17 = vector.load %arg2[%c252, %c0_18] : memref<264x128xf32, #tpu.memory_space<vmem>>, vector<1x128xf32>
    %c253 = arith.constant 253 : index
    %c0_19 = arith.constant 0 : index
    %18 = vector.load %arg2[%c253, %c0_19] : memref<264x128xf32, #tpu.memory_space<vmem>>, vector<1x32xf32>
    %c254 = arith.constant 254 : index
    %c0_20 = arith.constant 0 : index
    %19 = vector.load %arg2[%c254, %c0_20] : memref<264x128xf32, #tpu.memory_space<vmem>>, vector<1x32xf32>
    %c255 = arith.constant 255 : index
    %c0_21 = arith.constant 0 : index
    %20 = vector.load %arg2[%c255, %c0_21] : memref<264x128xf32, #tpu.memory_space<vmem>>, vector<1x32xf32>
    %c256 = arith.constant 256 : index
    %c0_22 = arith.constant 0 : index
    %21 = vector.load %arg2[%c256, %c0_22] : memref<264x128xf32, #tpu.memory_space<vmem>>, vector<1x32xf32>
    %c257 = arith.constant 257 : index
    %c0_23 = arith.constant 0 : index
    %22 = vector.load %arg2[%c257, %c0_23] : memref<264x128xf32, #tpu.memory_space<vmem>>, vector<1x1xf32>
    %cst = arith.constant dense<0.000000e+00> : vector<16xf32>
    %23 = vector.multi_reduction <add>, %0, %cst [1] : vector<16x32xf32> to vector<16xf32>
    %24 = vector.shape_cast %23 : vector<16xf32> to vector<16x1xf32>
    %cst_24 = arith.constant 3.200000e+01 : f32
    %25 = vector.broadcast %cst_24 : f32 to vector<16x1xf32>
    %26 = arith.divf %24, %25 : vector<16x1xf32>
    %27 = vector.broadcast %26 : vector<16x1xf32> to vector<16x32xf32>
    %28 = arith.subf %0, %27 : vector<16x32xf32>
    %29 = arith.mulf %28, %28 : vector<16x32xf32>
    %cst_25 = arith.constant dense<0.000000e+00> : vector<16xf32>
    %30 = vector.multi_reduction <add>, %29, %cst_25 [1] : vector<16x32xf32> to vector<16xf32>
    %31 = vector.shape_cast %30 : vector<16xf32> to vector<16x1xf32>
    %cst_26 = arith.constant 3.200000e+01 : f32
    %32 = vector.broadcast %cst_26 : f32 to vector<16x1xf32>
    %33 = arith.divf %31, %32 : vector<16x1xf32>
    %34 = vector.broadcast %26 : vector<16x1xf32> to vector<16x32xf32>
    %35 = arith.subf %0, %34 : vector<16x32xf32>
    %cst_27 = arith.constant 9.99999974E-6 : f32
    %36 = vector.broadcast %cst_27 : f32 to vector<16x1xf32>
    %37 = arith.addf %33, %36 : vector<16x1xf32>
    %38 = math.rsqrt %37 : vector<16x1xf32>
    %39 = vector.broadcast %38 : vector<16x1xf32> to vector<16x32xf32>
    %40 = arith.mulf %35, %39 : vector<16x32xf32>
    %41 = vector.broadcast %12 : vector<1x32xf32> to vector<16x32xf32>
    %42 = arith.mulf %40, %41 : vector<16x32xf32>
    %43 = vector.broadcast %13 : vector<1x32xf32> to vector<16x32xf32>
    %44 = arith.addf %42, %43 : vector<16x32xf32>
    %cst_28 = arith.constant dense<0.000000e+00> : vector<16x96xf32>
    %45 = tpu.matmul %44, %1, %cst_28 {dimension_numbers = #tpu.dot_dimension_numbers<[1], [0], [0], [1], [0, 0, 1, 1], [], []>} : vector<16x32xf32>, vector<32x96xf32>, vector<16x96xf32> -> vector<16x96xf32>
    %46 = vector.broadcast %14 : vector<1x96xf32> to vector<16x96xf32>
    %47 = arith.addf %45, %46 : vector<16x96xf32>
    %48 = vector.extract_strided_slice %47 {offsets = [0, 32], sizes = [16, 32], strides = [1, 1]} : vector<16x96xf32> to vector<16x32xf32>
    %49 = vector.extract_strided_slice %47 {offsets = [0, 64], sizes = [16, 32], strides = [1, 1]} : vector<16x96xf32> to vector<16x32xf32>
    %50 = vector.extract_strided_slice %47 {offsets = [14, 0], sizes = [2, 32], strides = [1, 1]} : vector<16x96xf32> to vector<2x32xf32>
    %cst_29 = arith.constant dense<0.000000e+00> : vector<16x32xf32>
    %51 = tpu.matmul %9, %50, %cst_29 {dimension_numbers = #tpu.dot_dimension_numbers<[1], [0], [0], [1], [0, 0, 1, 1], [], []>} : vector<16x2xf32>, vector<2x32xf32>, vector<16x32xf32> -> vector<16x32xf32>
    %52 = arith.mulf %51, %48 : vector<16x32xf32>
    %cst_30 = arith.constant dense<0.000000e+00> : vector<16x4xf32>
    %53 = tpu.matmul %52, %7, %cst_30 {dimension_numbers = #tpu.dot_dimension_numbers<[1], [0], [0], [1], [0, 0, 1, 1], [], []>} : vector<16x32xf32>, vector<32x4xf32>, vector<16x4xf32> -> vector<16x4xf32>
    %cst_31 = arith.constant 0.353553385 : f32
    %54 = vector.broadcast %cst_31 : f32 to vector<16x4xf32>
    %55 = arith.mulf %53, %54 : vector<16x4xf32>
    %cst_32 = arith.constant dense<0xFF800000> : vector<16xf32>
    %56 = vector.multi_reduction <maximumf>, %55, %cst_32 [1] : vector<16x4xf32> to vector<16xf32>
    %57 = vector.shape_cast %56 : vector<16xf32> to vector<16x1xf32>
    %cst_33 = arith.constant dense<0xFF800000> : vector<1xf32>
    %58 = vector.multi_reduction <maximumf>, %57, %cst_33 [0] : vector<16x1xf32> to vector<1xf32>
    %59 = vector.shape_cast %58 : vector<1xf32> to vector<1x1xf32>
    %60 = vector.broadcast %59 : vector<1x1xf32> to vector<16x4xf32>
    %61 = arith.subf %55, %60 : vector<16x4xf32>
    %62 = math.exp %61 : vector<16x4xf32>
    %cst_34 = arith.constant dense<0.000000e+00> : vector<2x4xf32>
    %63 = tpu.matmul %10, %62, %cst_34 {dimension_numbers = #tpu.dot_dimension_numbers<[1], [0], [0], [1], [0, 0, 1, 1], [], []>} : vector<2x16xf32>, vector<16x4xf32>, vector<2x4xf32> -> vector<2x4xf32>
    %cst_35 = arith.constant dense<0.000000e+00> : vector<16x4xf32>
    %64 = tpu.matmul %9, %63, %cst_35 {dimension_numbers = #tpu.dot_dimension_numbers<[1], [0], [0], [1], [0, 0, 1, 1], [], []>} : vector<16x2xf32>, vector<2x4xf32>, vector<16x4xf32> -> vector<16x4xf32>
    %65 = arith.divf %62, %64 : vector<16x4xf32>
    %cst_36 = arith.constant dense<0.000000e+00> : vector<16x32xf32>
    %66 = tpu.matmul %65, %8, %cst_36 {dimension_numbers = #tpu.dot_dimension_numbers<[1], [0], [0], [1], [0, 0, 1, 1], [], []>} : vector<16x4xf32>, vector<4x32xf32>, vector<16x32xf32> -> vector<16x32xf32>
    %67 = arith.mulf %66, %49 : vector<16x32xf32>
    %cst_37 = arith.constant dense<0.000000e+00> : vector<2x32xf32>
    %68 = tpu.matmul %10, %67, %cst_37 {dimension_numbers = #tpu.dot_dimension_numbers<[1], [0], [0], [1], [0, 0, 1, 1], [], []>} : vector<2x16xf32>, vector<16x32xf32>, vector<2x32xf32> -> vector<2x32xf32>
    %cst_38 = arith.constant dense<0.000000e+00> : vector<2x32xf32>
    %69 = tpu.matmul %68, %2, %cst_38 {dimension_numbers = #tpu.dot_dimension_numbers<[1], [0], [0], [1], [0, 0, 1, 1], [], []>} : vector<2x32xf32>, vector<32x32xf32>, vector<2x32xf32> -> vector<2x32xf32>
    %70 = vector.broadcast %15 : vector<1x32xf32> to vector<2x32xf32>
    %71 = arith.addf %69, %70 : vector<2x32xf32>
    %cst_39 = arith.constant dense<0.000000e+00> : vector<16x32xf32>
    %72 = tpu.matmul %9, %71, %cst_39 {dimension_numbers = #tpu.dot_dimension_numbers<[1], [0], [0], [1], [0, 0, 1, 1], [], []>} : vector<16x2xf32>, vector<2x32xf32>, vector<16x32xf32> -> vector<16x32xf32>
    %73 = arith.addf %44, %72 : vector<16x32xf32>
    %cst_40 = arith.constant dense<0.000000e+00> : vector<16x128xf32>
    %74 = tpu.matmul %73, %3, %cst_40 {dimension_numbers = #tpu.dot_dimension_numbers<[1], [0], [0], [1], [0, 0, 1, 1], [], []>} : vector<16x32xf32>, vector<32x128xf32>, vector<16x128xf32> -> vector<16x128xf32>
    %75 = vector.broadcast %16 : vector<1x128xf32> to vector<16x128xf32>
    %76 = arith.addf %74, %75 : vector<16x128xf32>
    %cst_41 = arith.constant 0.000000e+00 : f32
    %77 = vector.broadcast %cst_41 : f32 to vector<2x32xf32>
    %cst_42 = arith.constant 0.000000e+00 : f32
    %78 = vector.broadcast %cst_42 : f32 to vector<2x32xf32>
    %79 = vector.extract_strided_slice %76 {offsets = [0, 0], sizes = [2, 128], strides = [1, 1]} : vector<16x128xf32> to vector<2x128xf32>
    %cst_43 = arith.constant dense<0.000000e+00> : vector<2x128xf32>
    %80 = tpu.matmul %77, %4, %cst_43 {dimension_numbers = #tpu.dot_dimension_numbers<[1], [0], [0], [1], [0, 0, 1, 1], [], []>} : vector<2x32xf32>, vector<32x128xf32>, vector<2x128xf32> -> vector<2x128xf32>
    %81 = arith.addf %79, %80 : vector<2x128xf32>
    %82 = vector.broadcast %17 : vector<1x128xf32> to vector<2x128xf32>
    %83 = arith.addf %81, %82 : vector<2x128xf32>
    %84 = vector.extract_strided_slice %83 {offsets = [0, 0], sizes = [2, 32], strides = [1, 1]} : vector<2x128xf32> to vector<2x32xf32>
    %85 = arith.negf %84 : vector<2x32xf32>
    %86 = math.exp %85 : vector<2x32xf32>
    %cst_44 = arith.constant 1.000000e+00 : f32
    %87 = vector.broadcast %cst_44 : f32 to vector<2x32xf32>
    %88 = arith.addf %87, %86 : vector<2x32xf32>
    %89 = arith.divf %87, %88 : vector<2x32xf32>
    %90 = vector.extract_strided_slice %83 {offsets = [0, 32], sizes = [2, 32], strides = [1, 1]} : vector<2x128xf32> to vector<2x32xf32>
    %91 = arith.negf %90 : vector<2x32xf32>
    %92 = math.exp %91 : vector<2x32xf32>
    %cst_45 = arith.constant 1.000000e+00 : f32
    %93 = vector.broadcast %cst_45 : f32 to vector<2x32xf32>
    %94 = arith.addf %93, %92 : vector<2x32xf32>
    %95 = arith.divf %93, %94 : vector<2x32xf32>
    %96 = vector.extract_strided_slice %83 {offsets = [0, 64], sizes = [2, 32], strides = [1, 1]} : vector<2x128xf32> to vector<2x32xf32>
    %97 = math.tanh %96 : vector<2x32xf32>
    %98 = vector.extract_strided_slice %83 {offsets = [0, 96], sizes = [2, 32], strides = [1, 1]} : vector<2x128xf32> to vector<2x32xf32>
    %99 = arith.negf %98 : vector<2x32xf32>
    %100 = math.exp %99 : vector<2x32xf32>
    %cst_46 = arith.constant 1.000000e+00 : f32
    %101 = vector.broadcast %cst_46 : f32 to vector<2x32xf32>
    %102 = arith.addf %101, %100 : vector<2x32xf32>
    %103 = arith.divf %101, %102 : vector<2x32xf32>
    %104 = arith.mulf %95, %78 : vector<2x32xf32>
    %105 = arith.mulf %89, %97 : vector<2x32xf32>
    %106 = arith.addf %104, %105 : vector<2x32xf32>
    %107 = math.tanh %106 : vector<2x32xf32>
    %108 = arith.mulf %103, %107 : vector<2x32xf32>
    %109 = vector.extract_strided_slice %76 {offsets = [2, 0], sizes = [2, 128], strides = [1, 1]} : vector<16x128xf32> to vector<2x128xf32>
    %cst_47 = arith.constant dense<0.000000e+00> : vector<2x128xf32>
    %110 = tpu.matmul %108, %4, %cst_47 {dimension_numbers = #tpu.dot_dimension_numbers<[1], [0], [0], [1], [0, 0, 1, 1], [], []>} : vector<2x32xf32>, vector<32x128xf32>, vector<2x128xf32> -> vector<2x128xf32>
    %111 = arith.addf %109, %110 : vector<2x128xf32>
    %112 = vector.broadcast %17 : vector<1x128xf32> to vector<2x128xf32>
    %113 = arith.addf %111, %112 : vector<2x128xf32>
    %114 = vector.extract_strided_slice %113 {offsets = [0, 0], sizes = [2, 32], strides = [1, 1]} : vector<2x128xf32> to vector<2x32xf32>
    %115 = arith.negf %114 : vector<2x32xf32>
    %116 = math.exp %115 : vector<2x32xf32>
    %cst_48 = arith.constant 1.000000e+00 : f32
    %117 = vector.broadcast %cst_48 : f32 to vector<2x32xf32>
    %118 = arith.addf %117, %116 : vector<2x32xf32>
    %119 = arith.divf %117, %118 : vector<2x32xf32>
    %120 = vector.extract_strided_slice %113 {offsets = [0, 32], sizes = [2, 32], strides = [1, 1]} : vector<2x128xf32> to vector<2x32xf32>
    %121 = arith.negf %120 : vector<2x32xf32>
    %122 = math.exp %121 : vector<2x32xf32>
    %cst_49 = arith.constant 1.000000e+00 : f32
    %123 = vector.broadcast %cst_49 : f32 to vector<2x32xf32>
    %124 = arith.addf %123, %122 : vector<2x32xf32>
    %125 = arith.divf %123, %124 : vector<2x32xf32>
    %126 = vector.extract_strided_slice %113 {offsets = [0, 64], sizes = [2, 32], strides = [1, 1]} : vector<2x128xf32> to vector<2x32xf32>
    %127 = math.tanh %126 : vector<2x32xf32>
    %128 = vector.extract_strided_slice %113 {offsets = [0, 96], sizes = [2, 32], strides = [1, 1]} : vector<2x128xf32> to vector<2x32xf32>
    %129 = arith.negf %128 : vector<2x32xf32>
    %130 = math.exp %129 : vector<2x32xf32>
    %cst_50 = arith.constant 1.000000e+00 : f32
    %131 = vector.broadcast %cst_50 : f32 to vector<2x32xf32>
    %132 = arith.addf %131, %130 : vector<2x32xf32>
    %133 = arith.divf %131, %132 : vector<2x32xf32>
    %134 = arith.mulf %125, %106 : vector<2x32xf32>
    %135 = arith.mulf %119, %127 : vector<2x32xf32>
    %136 = arith.addf %134, %135 : vector<2x32xf32>
    %137 = math.tanh %136 : vector<2x32xf32>
    %138 = arith.mulf %133, %137 : vector<2x32xf32>
    %139 = vector.extract_strided_slice %76 {offsets = [4, 0], sizes = [2, 128], strides = [1, 1]} : vector<16x128xf32> to vector<2x128xf32>
    %cst_51 = arith.constant dense<0.000000e+00> : vector<2x128xf32>
    %140 = tpu.matmul %138, %4, %cst_51 {dimension_numbers = #tpu.dot_dimension_numbers<[1], [0], [0], [1], [0, 0, 1, 1], [], []>} : vector<2x32xf32>, vector<32x128xf32>, vector<2x128xf32> -> vector<2x128xf32>
    %141 = arith.addf %139, %140 : vector<2x128xf32>
    %142 = vector.broadcast %17 : vector<1x128xf32> to vector<2x128xf32>
    %143 = arith.addf %141, %142 : vector<2x128xf32>
    %144 = vector.extract_strided_slice %143 {offsets = [0, 0], sizes = [2, 32], strides = [1, 1]} : vector<2x128xf32> to vector<2x32xf32>
    %145 = arith.negf %144 : vector<2x32xf32>
    %146 = math.exp %145 : vector<2x32xf32>
    %cst_52 = arith.constant 1.000000e+00 : f32
    %147 = vector.broadcast %cst_52 : f32 to vector<2x32xf32>
    %148 = arith.addf %147, %146 : vector<2x32xf32>
    %149 = arith.divf %147, %148 : vector<2x32xf32>
    %150 = vector.extract_strided_slice %143 {offsets = [0, 32], sizes = [2, 32], strides = [1, 1]} : vector<2x128xf32> to vector<2x32xf32>
    %151 = arith.negf %150 : vector<2x32xf32>
    %152 = math.exp %151 : vector<2x32xf32>
    %cst_53 = arith.constant 1.000000e+00 : f32
    %153 = vector.broadcast %cst_53 : f32 to vector<2x32xf32>
    %154 = arith.addf %153, %152 : vector<2x32xf32>
    %155 = arith.divf %153, %154 : vector<2x32xf32>
    %156 = vector.extract_strided_slice %143 {offsets = [0, 64], sizes = [2, 32], strides = [1, 1]} : vector<2x128xf32> to vector<2x32xf32>
    %157 = math.tanh %156 : vector<2x32xf32>
    %158 = vector.extract_strided_slice %143 {offsets = [0, 96], sizes = [2, 32], strides = [1, 1]} : vector<2x128xf32> to vector<2x32xf32>
    %159 = arith.negf %158 : vector<2x32xf32>
    %160 = math.exp %159 : vector<2x32xf32>
    %cst_54 = arith.constant 1.000000e+00 : f32
    %161 = vector.broadcast %cst_54 : f32 to vector<2x32xf32>
    %162 = arith.addf %161, %160 : vector<2x32xf32>
    %163 = arith.divf %161, %162 : vector<2x32xf32>
    %164 = arith.mulf %155, %136 : vector<2x32xf32>
    %165 = arith.mulf %149, %157 : vector<2x32xf32>
    %166 = arith.addf %164, %165 : vector<2x32xf32>
    %167 = math.tanh %166 : vector<2x32xf32>
    %168 = arith.mulf %163, %167 : vector<2x32xf32>
    %169 = vector.extract_strided_slice %76 {offsets = [6, 0], sizes = [2, 128], strides = [1, 1]} : vector<16x128xf32> to vector<2x128xf32>
    %cst_55 = arith.constant dense<0.000000e+00> : vector<2x128xf32>
    %170 = tpu.matmul %168, %4, %cst_55 {dimension_numbers = #tpu.dot_dimension_numbers<[1], [0], [0], [1], [0, 0, 1, 1], [], []>} : vector<2x32xf32>, vector<32x128xf32>, vector<2x128xf32> -> vector<2x128xf32>
    %171 = arith.addf %169, %170 : vector<2x128xf32>
    %172 = vector.broadcast %17 : vector<1x128xf32> to vector<2x128xf32>
    %173 = arith.addf %171, %172 : vector<2x128xf32>
    %174 = vector.extract_strided_slice %173 {offsets = [0, 0], sizes = [2, 32], strides = [1, 1]} : vector<2x128xf32> to vector<2x32xf32>
    %175 = arith.negf %174 : vector<2x32xf32>
    %176 = math.exp %175 : vector<2x32xf32>
    %cst_56 = arith.constant 1.000000e+00 : f32
    %177 = vector.broadcast %cst_56 : f32 to vector<2x32xf32>
    %178 = arith.addf %177, %176 : vector<2x32xf32>
    %179 = arith.divf %177, %178 : vector<2x32xf32>
    %180 = vector.extract_strided_slice %173 {offsets = [0, 32], sizes = [2, 32], strides = [1, 1]} : vector<2x128xf32> to vector<2x32xf32>
    %181 = arith.negf %180 : vector<2x32xf32>
    %182 = math.exp %181 : vector<2x32xf32>
    %cst_57 = arith.constant 1.000000e+00 : f32
    %183 = vector.broadcast %cst_57 : f32 to vector<2x32xf32>
    %184 = arith.addf %183, %182 : vector<2x32xf32>
    %185 = arith.divf %183, %184 : vector<2x32xf32>
    %186 = vector.extract_strided_slice %173 {offsets = [0, 64], sizes = [2, 32], strides = [1, 1]} : vector<2x128xf32> to vector<2x32xf32>
    %187 = math.tanh %186 : vector<2x32xf32>
    %188 = vector.extract_strided_slice %173 {offsets = [0, 96], sizes = [2, 32], strides = [1, 1]} : vector<2x128xf32> to vector<2x32xf32>
    %189 = arith.negf %188 : vector<2x32xf32>
    %190 = math.exp %189 : vector<2x32xf32>
    %cst_58 = arith.constant 1.000000e+00 : f32
    %191 = vector.broadcast %cst_58 : f32 to vector<2x32xf32>
    %192 = arith.addf %191, %190 : vector<2x32xf32>
    %193 = arith.divf %191, %192 : vector<2x32xf32>
    %194 = arith.mulf %185, %166 : vector<2x32xf32>
    %195 = arith.mulf %179, %187 : vector<2x32xf32>
    %196 = arith.addf %194, %195 : vector<2x32xf32>
    %197 = math.tanh %196 : vector<2x32xf32>
    %198 = arith.mulf %193, %197 : vector<2x32xf32>
    %199 = vector.extract_strided_slice %76 {offsets = [8, 0], sizes = [2, 128], strides = [1, 1]} : vector<16x128xf32> to vector<2x128xf32>
    %cst_59 = arith.constant dense<0.000000e+00> : vector<2x128xf32>
    %200 = tpu.matmul %198, %4, %cst_59 {dimension_numbers = #tpu.dot_dimension_numbers<[1], [0], [0], [1], [0, 0, 1, 1], [], []>} : vector<2x32xf32>, vector<32x128xf32>, vector<2x128xf32> -> vector<2x128xf32>
    %201 = arith.addf %199, %200 : vector<2x128xf32>
    %202 = vector.broadcast %17 : vector<1x128xf32> to vector<2x128xf32>
    %203 = arith.addf %201, %202 : vector<2x128xf32>
    %204 = vector.extract_strided_slice %203 {offsets = [0, 0], sizes = [2, 32], strides = [1, 1]} : vector<2x128xf32> to vector<2x32xf32>
    %205 = arith.negf %204 : vector<2x32xf32>
    %206 = math.exp %205 : vector<2x32xf32>
    %cst_60 = arith.constant 1.000000e+00 : f32
    %207 = vector.broadcast %cst_60 : f32 to vector<2x32xf32>
    %208 = arith.addf %207, %206 : vector<2x32xf32>
    %209 = arith.divf %207, %208 : vector<2x32xf32>
    %210 = vector.extract_strided_slice %203 {offsets = [0, 32], sizes = [2, 32], strides = [1, 1]} : vector<2x128xf32> to vector<2x32xf32>
    %211 = arith.negf %210 : vector<2x32xf32>
    %212 = math.exp %211 : vector<2x32xf32>
    %cst_61 = arith.constant 1.000000e+00 : f32
    %213 = vector.broadcast %cst_61 : f32 to vector<2x32xf32>
    %214 = arith.addf %213, %212 : vector<2x32xf32>
    %215 = arith.divf %213, %214 : vector<2x32xf32>
    %216 = vector.extract_strided_slice %203 {offsets = [0, 64], sizes = [2, 32], strides = [1, 1]} : vector<2x128xf32> to vector<2x32xf32>
    %217 = math.tanh %216 : vector<2x32xf32>
    %218 = vector.extract_strided_slice %203 {offsets = [0, 96], sizes = [2, 32], strides = [1, 1]} : vector<2x128xf32> to vector<2x32xf32>
    %219 = arith.negf %218 : vector<2x32xf32>
    %220 = math.exp %219 : vector<2x32xf32>
    %cst_62 = arith.constant 1.000000e+00 : f32
    %221 = vector.broadcast %cst_62 : f32 to vector<2x32xf32>
    %222 = arith.addf %221, %220 : vector<2x32xf32>
    %223 = arith.divf %221, %222 : vector<2x32xf32>
    %224 = arith.mulf %215, %196 : vector<2x32xf32>
    %225 = arith.mulf %209, %217 : vector<2x32xf32>
    %226 = arith.addf %224, %225 : vector<2x32xf32>
    %227 = math.tanh %226 : vector<2x32xf32>
    %228 = arith.mulf %223, %227 : vector<2x32xf32>
    %229 = vector.extract_strided_slice %76 {offsets = [10, 0], sizes = [2, 128], strides = [1, 1]} : vector<16x128xf32> to vector<2x128xf32>
    %cst_63 = arith.constant dense<0.000000e+00> : vector<2x128xf32>
    %230 = tpu.matmul %228, %4, %cst_63 {dimension_numbers = #tpu.dot_dimension_numbers<[1], [0], [0], [1], [0, 0, 1, 1], [], []>} : vector<2x32xf32>, vector<32x128xf32>, vector<2x128xf32> -> vector<2x128xf32>
    %231 = arith.addf %229, %230 : vector<2x128xf32>
    %232 = vector.broadcast %17 : vector<1x128xf32> to vector<2x128xf32>
    %233 = arith.addf %231, %232 : vector<2x128xf32>
    %234 = vector.extract_strided_slice %233 {offsets = [0, 0], sizes = [2, 32], strides = [1, 1]} : vector<2x128xf32> to vector<2x32xf32>
    %235 = arith.negf %234 : vector<2x32xf32>
    %236 = math.exp %235 : vector<2x32xf32>
    %cst_64 = arith.constant 1.000000e+00 : f32
    %237 = vector.broadcast %cst_64 : f32 to vector<2x32xf32>
    %238 = arith.addf %237, %236 : vector<2x32xf32>
    %239 = arith.divf %237, %238 : vector<2x32xf32>
    %240 = vector.extract_strided_slice %233 {offsets = [0, 32], sizes = [2, 32], strides = [1, 1]} : vector<2x128xf32> to vector<2x32xf32>
    %241 = arith.negf %240 : vector<2x32xf32>
    %242 = math.exp %241 : vector<2x32xf32>
    %cst_65 = arith.constant 1.000000e+00 : f32
    %243 = vector.broadcast %cst_65 : f32 to vector<2x32xf32>
    %244 = arith.addf %243, %242 : vector<2x32xf32>
    %245 = arith.divf %243, %244 : vector<2x32xf32>
    %246 = vector.extract_strided_slice %233 {offsets = [0, 64], sizes = [2, 32], strides = [1, 1]} : vector<2x128xf32> to vector<2x32xf32>
    %247 = math.tanh %246 : vector<2x32xf32>
    %248 = vector.extract_strided_slice %233 {offsets = [0, 96], sizes = [2, 32], strides = [1, 1]} : vector<2x128xf32> to vector<2x32xf32>
    %249 = arith.negf %248 : vector<2x32xf32>
    %250 = math.exp %249 : vector<2x32xf32>
    %cst_66 = arith.constant 1.000000e+00 : f32
    %251 = vector.broadcast %cst_66 : f32 to vector<2x32xf32>
    %252 = arith.addf %251, %250 : vector<2x32xf32>
    %253 = arith.divf %251, %252 : vector<2x32xf32>
    %254 = arith.mulf %245, %226 : vector<2x32xf32>
    %255 = arith.mulf %239, %247 : vector<2x32xf32>
    %256 = arith.addf %254, %255 : vector<2x32xf32>
    %257 = math.tanh %256 : vector<2x32xf32>
    %258 = arith.mulf %253, %257 : vector<2x32xf32>
    %259 = vector.extract_strided_slice %76 {offsets = [12, 0], sizes = [2, 128], strides = [1, 1]} : vector<16x128xf32> to vector<2x128xf32>
    %cst_67 = arith.constant dense<0.000000e+00> : vector<2x128xf32>
    %260 = tpu.matmul %258, %4, %cst_67 {dimension_numbers = #tpu.dot_dimension_numbers<[1], [0], [0], [1], [0, 0, 1, 1], [], []>} : vector<2x32xf32>, vector<32x128xf32>, vector<2x128xf32> -> vector<2x128xf32>
    %261 = arith.addf %259, %260 : vector<2x128xf32>
    %262 = vector.broadcast %17 : vector<1x128xf32> to vector<2x128xf32>
    %263 = arith.addf %261, %262 : vector<2x128xf32>
    %264 = vector.extract_strided_slice %263 {offsets = [0, 0], sizes = [2, 32], strides = [1, 1]} : vector<2x128xf32> to vector<2x32xf32>
    %265 = arith.negf %264 : vector<2x32xf32>
    %266 = math.exp %265 : vector<2x32xf32>
    %cst_68 = arith.constant 1.000000e+00 : f32
    %267 = vector.broadcast %cst_68 : f32 to vector<2x32xf32>
    %268 = arith.addf %267, %266 : vector<2x32xf32>
    %269 = arith.divf %267, %268 : vector<2x32xf32>
    %270 = vector.extract_strided_slice %263 {offsets = [0, 32], sizes = [2, 32], strides = [1, 1]} : vector<2x128xf32> to vector<2x32xf32>
    %271 = arith.negf %270 : vector<2x32xf32>
    %272 = math.exp %271 : vector<2x32xf32>
    %cst_69 = arith.constant 1.000000e+00 : f32
    %273 = vector.broadcast %cst_69 : f32 to vector<2x32xf32>
    %274 = arith.addf %273, %272 : vector<2x32xf32>
    %275 = arith.divf %273, %274 : vector<2x32xf32>
    %276 = vector.extract_strided_slice %263 {offsets = [0, 64], sizes = [2, 32], strides = [1, 1]} : vector<2x128xf32> to vector<2x32xf32>
    %277 = math.tanh %276 : vector<2x32xf32>
    %278 = vector.extract_strided_slice %263 {offsets = [0, 96], sizes = [2, 32], strides = [1, 1]} : vector<2x128xf32> to vector<2x32xf32>
    %279 = arith.negf %278 : vector<2x32xf32>
    %280 = math.exp %279 : vector<2x32xf32>
    %cst_70 = arith.constant 1.000000e+00 : f32
    %281 = vector.broadcast %cst_70 : f32 to vector<2x32xf32>
    %282 = arith.addf %281, %280 : vector<2x32xf32>
    %283 = arith.divf %281, %282 : vector<2x32xf32>
    %284 = arith.mulf %275, %256 : vector<2x32xf32>
    %285 = arith.mulf %269, %277 : vector<2x32xf32>
    %286 = arith.addf %284, %285 : vector<2x32xf32>
    %287 = math.tanh %286 : vector<2x32xf32>
    %288 = arith.mulf %283, %287 : vector<2x32xf32>
    %289 = vector.extract_strided_slice %76 {offsets = [14, 0], sizes = [2, 128], strides = [1, 1]} : vector<16x128xf32> to vector<2x128xf32>
    %cst_71 = arith.constant dense<0.000000e+00> : vector<2x128xf32>
    %290 = tpu.matmul %288, %4, %cst_71 {dimension_numbers = #tpu.dot_dimension_numbers<[1], [0], [0], [1], [0, 0, 1, 1], [], []>} : vector<2x32xf32>, vector<32x128xf32>, vector<2x128xf32> -> vector<2x128xf32>
    %291 = arith.addf %289, %290 : vector<2x128xf32>
    %292 = vector.broadcast %17 : vector<1x128xf32> to vector<2x128xf32>
    %293 = arith.addf %291, %292 : vector<2x128xf32>
    %294 = vector.extract_strided_slice %293 {offsets = [0, 0], sizes = [2, 32], strides = [1, 1]} : vector<2x128xf32> to vector<2x32xf32>
    %295 = arith.negf %294 : vector<2x32xf32>
    %296 = math.exp %295 : vector<2x32xf32>
    %cst_72 = arith.constant 1.000000e+00 : f32
    %297 = vector.broadcast %cst_72 : f32 to vector<2x32xf32>
    %298 = arith.addf %297, %296 : vector<2x32xf32>
    %299 = arith.divf %297, %298 : vector<2x32xf32>
    %300 = vector.extract_strided_slice %293 {offsets = [0, 32], sizes = [2, 32], strides = [1, 1]} : vector<2x128xf32> to vector<2x32xf32>
    %301 = arith.negf %300 : vector<2x32xf32>
    %302 = math.exp %301 : vector<2x32xf32>
    %cst_73 = arith.constant 1.000000e+00 : f32
    %303 = vector.broadcast %cst_73 : f32 to vector<2x32xf32>
    %304 = arith.addf %303, %302 : vector<2x32xf32>
    %305 = arith.divf %303, %304 : vector<2x32xf32>
    %306 = vector.extract_strided_slice %293 {offsets = [0, 64], sizes = [2, 32], strides = [1, 1]} : vector<2x128xf32> to vector<2x32xf32>
    %307 = math.tanh %306 : vector<2x32xf32>
    %308 = vector.extract_strided_slice %293 {offsets = [0, 96], sizes = [2, 32], strides = [1, 1]} : vector<2x128xf32> to vector<2x32xf32>
    %309 = arith.negf %308 : vector<2x32xf32>
    %310 = math.exp %309 : vector<2x32xf32>
    %cst_74 = arith.constant 1.000000e+00 : f32
    %311 = vector.broadcast %cst_74 : f32 to vector<2x32xf32>
    %312 = arith.addf %311, %310 : vector<2x32xf32>
    %313 = arith.divf %311, %312 : vector<2x32xf32>
    %314 = arith.mulf %305, %286 : vector<2x32xf32>
    %315 = arith.mulf %299, %307 : vector<2x32xf32>
    %316 = arith.addf %314, %315 : vector<2x32xf32>
    %317 = math.tanh %316 : vector<2x32xf32>
    %318 = arith.mulf %313, %317 : vector<2x32xf32>
    %319 = tpu.concatenate %108, %138, %168, %198, %228, %258, %288, %318 in 0 : vector<2x32xf32>, vector<2x32xf32>, vector<2x32xf32>, vector<2x32xf32>, vector<2x32xf32>, vector<2x32xf32>, vector<2x32xf32>, vector<2x32xf32> -> vector<16x32xf32>
    %cst_75 = arith.constant dense<0.000000e+00> : vector<16xf32>
    %320 = vector.multi_reduction <add>, %319, %cst_75 [1] : vector<16x32xf32> to vector<16xf32>
    %321 = vector.shape_cast %320 : vector<16xf32> to vector<16x1xf32>
    %cst_76 = arith.constant 3.200000e+01 : f32
    %322 = vector.broadcast %cst_76 : f32 to vector<16x1xf32>
    %323 = arith.divf %321, %322 : vector<16x1xf32>
    %324 = vector.broadcast %323 : vector<16x1xf32> to vector<16x32xf32>
    %325 = arith.subf %319, %324 : vector<16x32xf32>
    %326 = arith.mulf %325, %325 : vector<16x32xf32>
    %cst_77 = arith.constant dense<0.000000e+00> : vector<16xf32>
    %327 = vector.multi_reduction <add>, %326, %cst_77 [1] : vector<16x32xf32> to vector<16xf32>
    %328 = vector.shape_cast %327 : vector<16xf32> to vector<16x1xf32>
    %cst_78 = arith.constant 3.200000e+01 : f32
    %329 = vector.broadcast %cst_78 : f32 to vector<16x1xf32>
    %330 = arith.divf %328, %329 : vector<16x1xf32>
    %331 = vector.broadcast %323 : vector<16x1xf32> to vector<16x32xf32>
    %332 = arith.subf %319, %331 : vector<16x32xf32>
    %cst_79 = arith.constant 9.99999974E-6 : f32
    %333 = vector.broadcast %cst_79 : f32 to vector<16x1xf32>
    %334 = arith.addf %330, %333 : vector<16x1xf32>
    %335 = math.rsqrt %334 : vector<16x1xf32>
    %336 = vector.broadcast %335 : vector<16x1xf32> to vector<16x32xf32>
    %337 = arith.mulf %332, %336 : vector<16x32xf32>
    %338 = vector.broadcast %18 : vector<1x32xf32> to vector<16x32xf32>
    %339 = arith.mulf %337, %338 : vector<16x32xf32>
    %340 = vector.broadcast %19 : vector<1x32xf32> to vector<16x32xf32>
    %341 = arith.addf %339, %340 : vector<16x32xf32>
    %cst_80 = arith.constant dense<0.000000e+00> : vector<16x32xf32>
    %342 = tpu.matmul %341, %5, %cst_80 {dimension_numbers = #tpu.dot_dimension_numbers<[1], [0], [0], [1], [0, 0, 1, 1], [], []>} : vector<16x32xf32>, vector<32x32xf32>, vector<16x32xf32> -> vector<16x32xf32>
    %343 = vector.broadcast %20 : vector<1x32xf32> to vector<16x32xf32>
    %344 = arith.addf %342, %343 : vector<16x32xf32>
    %cst_81 = arith.constant 0.000000e+00 : f32
    %345 = vector.broadcast %cst_81 : f32 to vector<16x32xf32>
    %346 = arith.maximumf %344, %345 : vector<16x32xf32>
    %cst_82 = arith.constant dense<0.000000e+00> : vector<16x32xf32>
    %347 = tpu.matmul %346, %6, %cst_82 {dimension_numbers = #tpu.dot_dimension_numbers<[1], [0], [0], [1], [0, 0, 1, 1], [], []>} : vector<16x32xf32>, vector<32x32xf32>, vector<16x32xf32> -> vector<16x32xf32>
    %348 = vector.broadcast %21 : vector<1x32xf32> to vector<16x32xf32>
    %349 = arith.addf %347, %348 : vector<16x32xf32>
    %350 = arith.addf %349, %341 : vector<16x32xf32>
    %351 = tpu.transpose %350, [1, 0] : vector<16x32xf32> -> vector<32x16xf32>
    %cst_83 = arith.constant dense<0.000000e+00> : vector<1x16xf32>
    %352 = tpu.matmul %11, %351, %cst_83 {dimension_numbers = #tpu.dot_dimension_numbers<[1], [0], [0], [1], [0, 0, 1, 1], [], []>} : vector<1x32xf32>, vector<32x16xf32>, vector<1x16xf32> -> vector<1x16xf32>
    %353 = vector.broadcast %22 : vector<1x1xf32> to vector<1x16xf32>
    %354 = arith.addf %352, %353 : vector<1x16xf32>
    %c0_84 = arith.constant 0 : index
    %c0_85 = arith.constant 0 : index
    %355 = vector.load %arg3[%c0_84, %c0_85] : memref<1x16xf32, #tpu.memory_space<vmem>>, vector<1x16xf32>
    tpu.vector_store %arg3[%c0_84, %c0_85], %354 {strides = array<i32>} : memref<1x16xf32, #tpu.memory_space<vmem>>, vector<1x16xf32>,
    return
  }
  func.func @transform_0(%arg0: i32) -> (i32, i32) {
    %c0_i32 = arith.constant 0 : i32
    %c0_i32_0 = arith.constant 0 : i32
    %c0_i32_1 = arith.constant 0 : i32
    return %c0_i32, %c0_i32_0 : i32, i32
  }
  func.func @transform_1(%arg0: i32) -> (i32, i32) {
    %c0_i32 = arith.constant 0 : i32
    %c0_i32_0 = arith.constant 0 : i32
    %c0_i32_1 = arith.constant 0 : i32
    return %c0_i32, %c0_i32_0 : i32, i32
  }
  func.func @transform_2(%arg0: i32) -> (i32, i32) {
    %c0_i32 = arith.constant 0 : i32
    %c0_i32_0 = arith.constant 0 : i32
    %c0_i32_1 = arith.constant 0 : i32
    return %c0_i32, %c0_i32_0 : i32, i32
  }
}

</mosaic_0001>

<bundles_post_ra>
// kernel: tpu_custom_call.1
= control target key start
LH: loop header
LB: loop body
LE: loop exit
PB: predicated region body
PF: predicated region fallthrough
CT: control target
= control target key end

     0   :  { %7 = vsyncpa [#allocation3], 0  ;;  %s3069_s0 = inlined_call_operand.hbm [shape: f32[16,32], index: 0, kind: input, shape index: {}]   ;;  %s3070_s1 = inlined_call_operand.hbm [shape: f32[264,128], index: 1, kind: input, shape index: {}]   ;;  %s3071_s2 = inlined_call_operand.hbm [shape: f32[1,16], index: 2, kind: output, shape index: {}]  }
   0x1   :  { %8 = vsyncpa [#allocation6], 0 }
   0x2   :  { %9 = vsyncpa [#allocation4], 0  ;;  %s2790_s9 = smov [#allocation2]   ;;  %s2718_s13 = scalar_lea.hbm %s3069_s0, 256 }
   0x3   :  { %s15_s10 = sshll.u32 %s2790_s9, 4  ;;  %p2719_p0 = scmp.ne.s32.totalorder %s3069_s0, %s2718_s13  ;;  %s16_s10 = int_to_ptr.vmem [resolvable:$true] %s15_s10 }
   0x4   :  { %p2722_p1 = scmp.lt.u32.totalorder %s2718_s13, %s3069_s0 }
   0x6   :  { %p2724_p2 = pnand %p2722_p1, %p2719_p0 }
   0x8   :  { %2727 = shalt.err (!%p2724_p2)
}
   0x9   :  { %s2728_s18 = scalar_lea.vmem %s16_s10, 256  ;;  %p2733_p4 = scmp.lt.s32.totalorder %s16_s10, %s16_s10 }
   0xa   :  { %p2729_p3 = scmp.ne.s32.totalorder %s16_s10, %s2728_s18  ;;  %p2734_p5 = scmp.lt.s32.totalorder %s2728_s18, %s2728_s18 }
   0xc   :  { %p2735_p6 = por %p2734_p5, %p2733_p4 }
   0xe   :  { %p2736_p7 = pnand %p2735_p6, %p2729_p3 }
  0x10   :  { %2739 = shalt.err (!%p2736_p7)
}
  0x11   :  { %s2791_s19 = smov 128   ;;  %s2792_s20 = smov 8  }
  0x12   :  { %21 = dma.hbm_to_vmem [thread:$0]  %s3069_s0, 256, %s16_s10, [#allocation3], %s2791_s19, %s2791_s19, %s2792_s20  }
  0x13   :  { %s2793_s23 = smov [#allocation5]   ;;  %s2740_s27 = scalar_lea.hbm %s3070_s1, 4224 }
  0x14   :  { %s27_s24 = sshll.u32 %s2793_s23, 4  ;;  %p2741_p8 = scmp.ne.s32.totalorder %s3070_s1, %s2740_s27  ;;  %s28_s24 = int_to_ptr.vmem [resolvable:$true] %s27_s24 }
  0x15   :  { %p2744_p9 = scmp.lt.u32.totalorder %s2740_s27, %s3070_s1 }
  0x17   :  { %p2746_p10 = pnand %p2744_p9, %p2741_p8 }
  0x19   :  { %2749 = shalt.err (!%p2746_p10)
}
  0x1a   :  { %s2750_s4 = scalar_lea.vmem %s28_s24, 4224  ;;  %p2755_p12 = scmp.lt.s32.totalorder %s28_s24, %s28_s24 }
  0x1b   :  { %p2751_p11 = scmp.ne.s32.totalorder %s28_s24, %s2750_s4  ;;  %p2756_p13 = scmp.lt.s32.totalorder %s2750_s4, %s2750_s4 }
  0x1d   :  { %p2757_p0 = por %p2756_p13, %p2755_p12 }
  0x1f   :  { %p2758_p1 = pnand %p2757_p0, %p2751_p11 }
  0x21   :  { %2761 = shalt.err (!%p2758_p1)
}
  0x22   :  { %33 = dma.hbm_to_vmem [thread:$0]  %s3070_s1, 4224, %s28_s24, [#allocation6], %s2791_s19, %s2791_s19, %s2792_s20  }
  0x23   :  { %2784 = dma.done.wait [#allocation3], 256  }
  0x24   :  { %2785 = vsyncadd [#allocation3], 4294967040 }
  0x25   :  { %2786 = dma.done.wait [#allocation6], 4224  }
  0x26   :  { %2787 = vsyncadd [#allocation6], 4294963072  ;;  %vm86_vm0 = vcmask 261120   ;;  %v40_v0 = vld [vmem:[#allocation2] sm:$0xff]  ;;  %v41_v1 = vld [vmem:[#allocation2 + $0x8] sm:$0xff]  ;;  %vm213_vm1 = vcmask 15360  }
  0x27   :  { %v87_v2 = vsel %vm86_vm0, %v40_v0, 0.0  ;;  %v90_v3 = vsel %vm86_vm0, %v41_v1, 0.0  ;;  %v42_v14 = vld [vmem:[#allocation5] sm:$0xff]  ;;  %v43_v15 = vld [vmem:[#allocation5 + $0x8] sm:$0xff]  ;;  %v44_v16 = vld [vmem:[#allocation5 + $0x10] sm:$0xff]  ;;  %vm220_vm2 = vcmask 1041408  }
  0x28   :  { %88 = vadd.xlane.f32.xlu0 %v87_v2  ;;  %v2520_v17 = vpack.c.bf16 %v43_v15, %v42_v14  ;;  %v45_v18 = vld [vmem:[#allocation5 + $0x18] sm:$0xff]  ;;  %v2176_v27 = vld [vmem:[#allocation5 + $0xf7] ss:$0 sm:$0xff]  ;;  %v2853_v36 = vld [vmem:[#allocation5 + $0xe4] sm:$0xff]  ;;  %s2794_s1 = smov 96   ;;  %vm390_vm3 = vcmask 31744  }
  0x29   :  { %v2524_v19 = vpack.c.bf16 %v45_v18, %v44_v16  ;;  %v2177_v29 = vld [vmem:[#allocation5 + $0xf8] ss:$0 sm:$0xff]  ;;  %2338 = vmatprep.mubr.msk.f32.mxu1 %vm213_vm1, %v2853_v36  ;;  %v2178_v37 = vld [vmem:[#allocation5 + $0xf9] ss:$0 sm:$0xff]  ;;  %v66_v39 = vld [vmem:[#allocation5 + $0xc0] sm:$0xff]  ;;  %s2795_s6 = smov 64  }
  0x2a   :  { %2521 = vmatprep.subr.bf16.mxu0 %v2520_v17  ;;  %v67_v40 = vld [vmem:[#allocation5 + $0xc8] sm:$0xff]  ;;  %v68_v47 = vld [vmem:[#allocation5 + $0xd0] sm:$0xff]  ;;  %v69_v48 = vld [vmem:[#allocation5 + $0xd8] sm:$0xff]  ;;  %v2796_v62 = vmov 0.0|0.0   ;;  %vm2797_vm4 = vmmov 0   ;;  %v2798_v63 = vmov 0.0  }
  0x2b   :  { %2523 = vmatpush3.bf16.msra.mxu0 %v2520_v17  ;;  %v2528_v45 = vpack.c.bf16 %v67_v40, %v66_v39  ;;  %v2859_v46 = vld [vmem:[#allocation5 + $0xec] sm:$0xff]  ;;  %v2532_v49 = vpack.c.bf16 %v69_v48, %v68_v47  ;;  %v73_v16 = vld [vmem:[#allocation5 + $0xf4] sm:$0x3]  ;;  %vm410_vm5 = vcmask 130048   ;;  %vm572_vm6 = vcmask 1043456   ;;  %s2799_s7 = smov 32   ;;  %vm2622_vm8 = vmpackc.low %vm86_vm0, %vm86_vm0 }
  0x2c   :  { %91 = vadd.xlane.f32.xlu0 %v90_v3  ;;  %2525 = vmatprep.subr.bf16.mxu0 %v2524_v19  ;;  %v51_v47 = vld [vmem:[#allocation5 + $0x48] sm:$0xff]  ;;  %vm1827_vm7 = vcmask 1045504   ;;  %s2801_s8 = smov [#allocation7]   ;;  %vm2158_vm9 = vcmask 122880  }
  0x2d   :  { %s2166_s9 = sshll.u32 %s2801_s8, 4  ;;  %s2167_s9 = int_to_ptr.vmem [resolvable:$true] %s2166_s9 }
  0x2e   :  { %s2762_s10 = scalar_lea.vmem %s2167_s9, 16  ;;  %s2766_s11 = scalar_lea.vmem %s2167_s9, 32 }
  0x2f   :  { %2527 = vmatpush3.bf16.msra.mxu0 %v2524_v19  ;;  %v70_v19 = vld [vmem:[#allocation5 + $0xe0] sm:$0xf]  ;;  %p2763_p2 = scmp.ne.s32.totalorder %s2167_s9, %s2762_s10  ;;  %p2767_p3 = scmp.lt.s32.totalorder %s2167_s9, %s2167_s9 }
  0x30   :  { %2536 = vmatprep.subr.bf16.mxu0 %v2796_v62  ;;  %p2768_p4 = scmp.lt.s32.totalorder %s2766_s11, %s2762_s10 }
  0x32   :  { %p2769_p5 = por %p2768_p4, %p2767_p3 }
  0x34   :  { %p2770_p6 = pnand %p2769_p5, %p2763_p2 }
  0xb5   :  { %v89_v4 = vpop.xlane.xlu0 %88 }
  0xb6   :  { %v94_v5 = vmul.f32 0.03125, %v89_v4 }
  0xb8   :  { %v96_v6 = vsub.f32 %v40_v0, %v94_v5 }
  0xb9   :  { %v92_v7 = vpop.xlane.xlu0 %91 }
  0xba   :  { %v95_v8 = vmul.f32 0.03125, %v92_v7  ;;  %v98_v9 = vmul.f32 %v96_v6, %v96_v6 }
  0xbc   :  { %v97_v10 = vsub.f32 %v41_v1, %v95_v8  ;;  %v100_v11 = vsel %vm86_vm0, %v98_v9, 0.0 }
  0xbd   :  { %101 = vadd.xlane.f32.xlu1 %v100_v11 }
  0xbe   :  { %v99_v12 = vmul.f32 %v97_v10, %v97_v10 }
  0xc0   :  { %v103_v13 = vsel %vm86_vm0, %v99_v12, 0.0 }
  0xc1   :  { %104 = vadd.xlane.f32.xlu1 %v103_v13 }
 0x14a   :  { %v102_v20 = vpop.xlane.xlu1 %101 }
 0x14b   :  { %v106_v21 = vmul.f32 0.03125, %v102_v20 }
 0x14d   :  { %v108_v22 = vadd.f32 1e-05, %v106_v21 }
 0x14e   :  { %v105_v23 = vpop.xlane.xlu1 %104 }
 0x14f   :  { %2638 = vrsqrt.f32 %v108_v22  ;;  %v107_v24 = vmul.f32 0.03125, %v105_v23 }
 0x151   :  { %v109_v25 = vadd.f32 1e-05, %v107_v24 }
 0x153   :  { %2640 = vrsqrt.f32 %v109_v25 }
 0x159   :  { %v2639_v26 = vpop.eup %2638 }
 0x15a   :  { %v112_v28 = vmul.f32 %v2639_v26, %v96_v6  ;;  %v46_v26 = vld [vmem:[#allocation5 + $0x20] sm:$0xff] }
 0x15c   :  { %v118_v30 = vmul.f32 %v2176_v27, %v112_v28  ;;  %v48_v28 = vld [vmem:[#allocation5 + $0x30] sm:$0xff] }
 0x15d   :  { %v2641_v31 = vpop.eup %2640 }
 0x15e   :  { %v113_v32 = vmul.f32 %v2641_v31, %v97_v10  ;;  %v2845_v33 = vadd.f32 %v2177_v29, %v118_v30  ;;  %v49_v30 = vld [vmem:[#allocation5 + $0x38] sm:$0xff] }
 0x15f   :  { %v2546_v31 = vpack.c.bf16 %v49_v30, %v48_v28 }
 0x160   :  { %v119_v34 = vmul.f32 %v2176_v27, %v113_v32  ;;  %2333 = vmatprep.mubr.msk.f32.mxu0 %vm86_vm0, %v2845_v33  ;;  %v47_v27 = vld [vmem:[#allocation5 + $0x28] sm:$0xff] }
 0x162   :  { %v2849_v35 = vadd.f32 %v2177_v29, %v119_v34  ;;  %v2543_v29 = vpack.c.bf16 %v47_v27, %v46_v26 }
 0x164   :  { %2334 = vmatmul.mubr.msk.f32.vlgmr.msra.gmra.mrb[0].mxu0 %vm86_vm0, %v2849_v35 }
 0x165   :  { %2356 = vmatprep.mubr.msk.f32.mxu0 %vm2797_vm4, %v2798_v63 }
 0x237   :  { %v2335_v38 = vpop.f32.mrb[0].mxu0 }
 0x238   :  { %v208_v41 = vadd.f32 %v2335_v38, %v2178_v37  ;;  %v202_v42 = vpop.f32.mrb[1].mxu0 }
 0x239   :  { %v203_v43 = vadd.f32 %v2178_v37, %v202_v42 }
 0x23a   :  { %301 = vrot.lane.b32.xlu1 %v208_v41, %s2794_s1  ;;  %v212_v44 = vrot.slane %v208_v41, 6 }
 0x23b   :  { %299 = vrot.lane.b32.xlu0 %v203_v43, %s2794_s1 }
 0x23c   :  { %2336 = vmatprep.subr.msk.mxu1 %vm220_vm2, %v212_v44 }
 0x23d   :  { %2337 = vmatpush3.msk.msra.mxu1 %vm220_vm2, %v212_v44  ;;  %v2194_v44 = vld [vmem:[#allocation5 + $0xfa] ss:$0 sm:$0xff] }
 0x23e   :  { %2339 = vmatmul.mubr.msk.f32.vlgmr.msra.gmra.mrb[0].mxu1 %vm213_vm1, %v2859_v46  ;;  %2529 = vmatprep.subr.bf16.mxu1 %v2528_v45 }
 0x23f   :  { %2531 = vmatpush3.bf16.msra.mxu1 %v2528_v45  ;;  %v50_v45 = vld [vmem:[#allocation5 + $0x40] sm:$0xff] }
 0x240   :  { %2533 = vmatprep.subr.bf16.mxu1 %v2532_v49 }
 0x243   :  { %2535 = vmatpush3.bf16.msra.mxu1 %v2532_v49 }
 0x2ac   :  { %v302_v53 = vpop.permute.xlu1 %301 }
 0x2ad   :  { %v300_v51 = vpop.permute.xlu0 %299 }
 0x311   :  { %v2340_v50 = vpop.f32.mrb[0].mxu1 }
 0x312   :  { %v289_v52 = vpop.f32.mrb[1].mxu1  ;;  %v306_v55 = vmul.f32 %v2340_v50, %v302_v53  ;;  %v52_v53 = vld [vmem:[#allocation5 + $0x50] sm:$0xff] }
 0x313   :  { %v305_v54 = vmul.f32 %v300_v51, %v289_v52  ;;  %v2548_v51 = vpack.c.bf16 %v51_v47, %v50_v45  ;;  %v55_v52 = vld [vmem:[#allocation5 + $0x68] sm:$0xff] }
 0x315   :  { %2349 = vmatprep.mubr.msk.f32.mxu1 %vm86_vm0, %v305_v54  ;;  %v53_v54 = vld [vmem:[#allocation5 + $0x58] sm:$0xff] }
 0x316   :  { %2350 = vmatmul.mubr.msk.f32.vlgmr.msra.gmra.mrb[2].mxu1 %vm86_vm0, %v306_v55 }
 0x317   :  { %2361 = vmatprep.mubr.msk.f32.mxu1 %vm213_vm1, %v2853_v36 }
 0x3e9   :  { %v2351_v56 = vpop.f32.mrb[2].mxu1 }
 0x3ea   :  { %v389_v57 = vmul.f32 0.35355338, %v2351_v56  ;;  %v379_v58 = vpop.f32.mrb[3].mxu1  ;;  %v2552_v56 = vpack.c.bf16 %v53_v54, %v52_v53 }
 0x3eb   :  { %v388_v59 = vmul.f32 0.35355338, %v379_v58  ;;  %v57_v58 = vld [vmem:[#allocation5 + $0x78] sm:$0xff] }
 0x3ec   :  { %v394_v60 = vsel %vm390_vm3, %v389_v57, -inf }
 0x3ed   :  { %395 = vmax.xlane.f32.xlu0 %v394_v60  ;;  %v391_v61 = vsel %vm390_vm3, %v388_v59, -inf }
 0x3ee   :  { %392 = vmax.xlane.f32.xlu1 %v391_v61 }
 0x3ff   :  { %653 = vrot.lane.b32.xlu1 %v208_v41, %s2795_s6 }
 0x403   :  { %651 = vrot.lane.b32.xlu0 %v203_v43, %s2795_s6 }
 0x47a   :  { %v396_v0 = vpop.xlane.xlu0 %395 }
 0x47b   :  { %v393_v1 = vpop.xlane.xlu1 %392 }
 0x47c   :  { %v397_v2 = vmax.f32 %v393_v1, %v396_v0 }
 0x47e   :  { %v398_v3 = vrot.slane %v397_v2, 4  ;;  %v652_v37 = vpop.permute.xlu0 %651 }
 0x47f   :  { %v654_v32 = vpop.permute.xlu1 %653 }
 0x480   :  { %v399_v4 = vmax.f32 %v397_v2, %v398_v3 }
 0x482   :  { %v400_v5 = vrot.slane %v399_v4, 2 }
 0x484   :  { %v401_v6 = vmax.f32 %v399_v4, %v400_v5 }
 0x486   :  { %v402_v7 = vrot.slane %v401_v6, 1 }
 0x488   :  { %v403_v8 = vmax.f32 %v401_v6, %v402_v7  ;;  %v2933_v6 = vld [vmem:[#allocation5 + $0xfc] ss:$0 sm:$0xff] }
 0x48a   :  { %v404_v9 = vsub.f32 %v388_v59, %v403_v8  ;;  %v405_v10 = vsub.f32 %v389_v57, %v403_v8  ;;  %v56_v57 = vld [vmem:[#allocation5 + $0x70] sm:$0xff] }
 0x48b   :  { %v2907_v59 = vpack.c.bf16 %v57_v58, %v56_v57 }
 0x48c   :  { %v406_v11 = vmul.f32 1.442695, %v404_v9  ;;  %v408_v12 = vmul.f32 1.442695, %v405_v10 }
 0x48e   :  { %2642 = vpow2.f32 %v406_v11 }
 0x48f   :  { %2644 = vpow2.f32 %v408_v12 }
 0x498   :  { %v2643_v13 = vpop.eup %2642 }
 0x499   :  { %v2645_v14 = vpop.eup %2644 }
 0x49a   :  { %v2537_v15 = vpack.c.bf16 %v2645_v14, %v2643_v13 }
 0x49c   :  { %2538 = vmatpush3.bf16.msra.mxu0 %v2537_v15 }
 0x49d   :  { %2364 = vmatprep.subr.msk.mxu0 %vm572_vm6, %v70_v19 }
 0x49f   :  { %2357 = vmatmul.mubr.msk.f32.vlgmr.msra.gmra.mrb[2].mxu0 %vm410_vm5, %v73_v16 }
 0x4a0   :  { %2365 = vmatpush3.msk.msra.mxu0 %vm572_vm6, %v70_v19 }
 0x4a1   :  { %2542 = vmatprep.subr.bf16.mxu0 %v2796_v62 }
 0x572   :  { %v480_v17 = vpop.f32.mrb[2].mxu0 }
 0x573   :  { %v2358_v18 = vpop.f32.mrb[3].mxu0  ;;  %2359 = vmatprep.subr.msk.mxu1 %vm220_vm2, %v480_v17 }
 0x574   :  { %2360 = vmatpush3.msk.msra.mxu1 %vm220_vm2, %v480_v17 }
 0x575   :  { %2362 = vmatmul.mubr.msk.f32.vlgmr.msra.gmra.mrb[4].mxu1 %vm213_vm1, %v2859_v46  ;;  %2539 = vmatprep.subr.bf16.mxu1 %v2796_v62 }
 0x576   :  { %2373 = vmatprep.mubr.msk.f32.mxu1 %vm2797_vm4, %v2798_v63 }
 0x648   :  { %v2363_v20 = vpop.f32.mrb[4].mxu1 }
 0x649   :  { %2646 = vrcp.f32 %v2363_v20  ;;  %v553_v21 = vpop.f32.mrb[5].mxu1 }
 0x64a   :  { %2648 = vrcp.f32 %v553_v21 }
 0x653   :  { %v2647_v22 = vpop.eup %2646 }
 0x654   :  { %v2649_v23 = vpop.eup %2648  ;;  %v565_v25 = vmul.f32 %v2647_v22, %v2645_v14 }
 0x655   :  { %v563_v24 = vmul.f32 %v2649_v23, %v2643_v13 }
 0x657   :  { %2366 = vmatprep.mubr.msk.f32.mxu0 %vm390_vm3, %v563_v24 }
 0x658   :  { %2367 = vmatmul.mubr.msk.f32.vlgmr.msra.gmra.mrb[4].mxu0 %vm390_vm3, %v565_v25 }
 0x659   :  { %2384 = vmatprep.mubr.msk.f32.mxu0 %vm2797_vm4, %v2798_v63  ;;  %2544 = vmatpush3.bf16.msra.mxu0 %v2543_v29 }
 0x65a   :  { %2545 = vmatprep.subr.bf16.mxu0 %v2796_v62 }
 0x65d   :  { %2547 = vmatpush3.bf16.msra.mxu0 %v2546_v31 }
 0x65e   :  { %2556 = vmatprep.subr.bf16.mxu0 %v2796_v62 }
 0x72b   :  { %v2368_v34 = vpop.f32.mrb[4].mxu0 }
 0x72c   :  { %v658_v38 = vmul.f32 %v2368_v34, %v654_v32  ;;  %v642_v39 = vpop.f32.mrb[5].mxu0 }
 0x72d   :  { %v657_v40 = vmul.f32 %v652_v37, %v642_v39 }
 0x72f   :  { %v2540_v41 = vpack.c.bf16 %v658_v38, %v657_v40 }
 0x731   :  { %2541 = vmatpush3.bf16.msra.mxu1 %v2540_v41 }
 0x734   :  { %2374 = vmatmul.mubr.msk.f32.vlgmr.msra.gmra.mrb[6].mxu1 %vm410_vm5, %v73_v16 }
 0x735   :  { %2389 = vmatprep.mubr.msk.f32.mxu1 %vm213_vm1, %v2853_v36  ;;  %v54_v36 = vld [vmem:[#allocation5 + $0x60] sm:$0xff] }
 0x736   :  { %v2903_v55 = vpack.c.bf16 %v55_v52, %v54_v36 }
 0x807   :  { %v725_v42 = vpop.f32.mrb[6].mxu1 }
 0x808   :  { %v2375_v43 = vpop.f32.mrb[7].mxu1  ;;  %2385 = vmatmul.mubr.msk.f32.vlgmr.msra.gmra.mrb[6].mxu0 %vm86_vm0, %v725_v42 }
 0x809   :  { %2411 = vmatprep.mubr.msk.f32.mxu0 %vm2797_vm4, %v2798_v63  ;;  %2558 = vmatpush3.bf16.msra.mxu0 %v2903_v55 }
 0x80a   :  { %2559 = vmatprep.subr.bf16.mxu0 %v2796_v62 }
 0x80d   :  { %2561 = vmatpush3.bf16.msra.mxu0 %v2907_v59 }
 0x80e   :  { %2568 = vmatprep.subr.bf16.mxu0 %v2796_v62 }
 0x810   :  { %2412 = vmatmul.mubr.f32.vlgmr.msra.gmra.mrb[8].mxu0 %v2798_v63 }
 0x811   :  { %2570 = vmatpush3.bf16.msra.mxu0 %v2903_v55  ;;  %2433 = vmatprep.mubr.msk.f32.mxu0 %vm2797_vm4, %v2798_v63 }
 0x812   :  { %2571 = vmatprep.subr.bf16.mxu0 %v2796_v62 }
 0x815   :  { %2573 = vmatpush3.bf16.msra.mxu0 %v2907_v59 }
 0x816   :  { %2580 = vmatprep.subr.bf16.mxu0 %v2796_v62 }
 0x8db   :  { %v802_v48 = vpop.f32.mrb[6].mxu0 }
 0x8dc   :  { %v803_v49 = vadd.f32 %v2194_v44, %v802_v48  ;;  %v2386_v50 = vpop.f32.mrb[7].mxu0 }
 0x8de   :  { %2387 = vmatprep.subr.msk.mxu1 %vm220_vm2, %v803_v49 }
 0x8df   :  { %2388 = vmatpush3.msk.msra.mxu1 %vm220_vm2, %v803_v49 }
 0x8e0   :  { %2390 = vmatmul.mubr.msk.f32.vlgmr.msra.gmra.mrb[8].mxu1 %vm213_vm1, %v2859_v46  ;;  %2549 = vmatprep.subr.bf16.mxu1 %v2548_v51 }
 0x8e1   :  { %2551 = vmatpush3.bf16.msra.mxu1 %v2548_v51 }
 0x8e2   :  { %2553 = vmatprep.subr.bf16.mxu1 %v2552_v56 }
 0x8e3   :  { %v1040_v1 = vpop.f32.mrb[8].mxu0 }
 0x8e4   :  { %v2413_v2 = vpop.f32.mrb[9].mxu0 }
 0x8e5   :  { %2555 = vmatpush3.bf16.msra.mxu1 %v2552_v56 }
 0x8e6   :  { %2562 = vmatprep.subr.bf16.mxu1 %v2796_v62 }
 0x9b3   :  { %v2391_v46 = vpop.f32.mrb[8].mxu1 }
 0x9b4   :  { %v875_v60 = vpop.f32.mrb[9].mxu1  ;;  %v885_v0 = vadd.f32 %v2391_v46, %v2849_v35 }
 0x9b5   :  { %v884_v61 = vadd.f32 %v875_v60, %v2845_v33  ;;  %v2199_v33 = vld [vmem:[#allocation5 + $0xfb] ss:$0 sm:$0xff] }
 0x9b7   :  { %2400 = vmatprep.mubr.msk.f32.mxu1 %vm86_vm0, %v884_v61 }
 0x9b8   :  { %2401 = vmatmul.mubr.msk.f32.vlgmr.msra.gmra.mrb[10].mxu1 %vm86_vm0, %v885_v0 }
 0x9b9   :  { %2564 = vmatpush3.bf16.msra.mxu1 %v2903_v55  ;;  %2422 = vmatprep.mubr.msk.f32.mxu1 %vm2797_vm4, %v2798_v63 }
 0x9ba   :  { %2565 = vmatprep.subr.bf16.mxu1 %v2796_v62 }
 0x9bd   :  { %2567 = vmatpush3.bf16.msra.mxu1 %v2907_v59 }
 0x9be   :  { %2574 = vmatprep.subr.bf16.mxu1 %v2796_v62 }
 0xa8b   :  { %v2402_v3 = vpop.f32.mrb[10].mxu1 }
 0xa8c   :  { %v2929_v35 = vadd.f32 %v2402_v3, %v2199_v33  ;;  %v962_v4 = vpop.f32.mrb[11].mxu1 }
 0xa8d   :  { %v2931_v5 = vadd.f32 %v2199_v33, %v962_v4 }
 0xa8f   :  { %v1044_v7 = vadd.f32 %v1040_v1, %v2931_v5 }
 0xa91   :  { %v1049_v8 = vadd.f32 %v2933_v6, %v1044_v7 }
 0xa93   :  { %2650 = vtanh.f32 %v1049_v8  ;;  %v2203_v10 = vmul.f32 -1.442695, %v1049_v8 }
 0xa95   :  { %2652 = vpow2.f32 %v2203_v10 }
 0xa9d   :  { %v2651_v9 = vpop.eup %2650 }
 0xa9e   :  { %1059 = vrot.lane.b32.xlu1 %v2651_v9, %s2795_s6 }
 0xa9f   :  { %v2653_v11 = vpop.eup %2652 }
 0xaa0   :  { %v1053_v12 = vadd.f32 1.0, %v2653_v11 }
 0xaa2   :  { %2654 = vrcp.f32 %v1053_v12 }
 0xaac   :  { %v2655_v13 = vpop.eup %2654 }
 0xaad   :  { %v1057_v16 = vmul.f32 0.0, %v2655_v13 }
 0xb10   :  { %v1060_v14 = vpop.permute.xlu1 %1059 }
 0xb11   :  { %v1062_v15 = vmul.f32 %v2655_v13, %v1060_v14 }
 0xb13   :  { %1064 = vrot.lane.b32.xlu1 %v1062_v15, %s2799_s7 }
 0xb85   :  { %v1065_v17 = vpop.permute.xlu1 %1064 }
 0xb86   :  { %v1067_v18 = vadd.f32 %v1065_v17, %v1057_v16 }
 0xb88   :  { %2656 = vtanh.f32 %v1067_v18  ;;  %v1162_v38 = vrot.slane %v1067_v18, 6 }
 0xb92   :  { %v2657_v19 = vpop.eup %2656 }
 0xb93   :  { %1070 = vrot.lane.b32.xlu0 %v2657_v19, %s2795_s6 }
 0xc05   :  { %v1071_v20 = vpop.permute.xlu0 %1070 }
 0xc06   :  { %v2940_v21 = vmul.f32 %v2655_v13, %v1071_v20 }
 0xc08   :  { %1075 = vrot.lane.b32.xlu1 %v2940_v21, %s2799_s7 }
 0xc7a   :  { %v1076_v22 = vpop.permute.xlu1 %1075 }
 0xc7b   :  { %2423 = vmatmul.mubr.msk.f32.vlgmr.msra.gmra.mrb[12].mxu1 %vm86_vm0, %v1076_v22 }
 0xc7c   :  { %2576 = vmatpush3.bf16.msra.mxu1 %v2903_v55  ;;  %2444 = vmatprep.mubr.msk.f32.mxu1 %vm2797_vm4, %v2798_v63 }
 0xc7d   :  { %2577 = vmatprep.subr.bf16.mxu1 %v2796_v62 }
 0xc80   :  { %2579 = vmatpush3.bf16.msra.mxu1 %v2907_v59 }
 0xc81   :  { %2586 = vmatprep.subr.bf16.mxu1 %v2796_v62 }
 0xd4e   :  { %v1145_v23 = vpop.f32.mrb[12].mxu1 }
 0xd4f   :  { %v1150_v24 = vrot.slane %v1145_v23, 6  ;;  %v2424_v25 = vpop.f32.mrb[13].mxu1 }
 0xd51   :  { %v1152_v26 = vadd.f32 %v1150_v24, %v2931_v5 }
 0xd53   :  { %v1153_v27 = vadd.f32 %v2933_v6, %v1152_v26 }
 0xd55   :  { %2658 = vtanh.f32 %v1153_v27  ;;  %v2205_v29 = vmul.f32 -1.442695, %v1153_v27 }
 0xd57   :  { %2660 = vpow2.f32 %v2205_v29 }
 0xd5f   :  { %v2659_v28 = vpop.eup %2658 }
 0xd60   :  { %1166 = vrot.lane.b32.xlu0 %v2659_v28, %s2795_s6 }
 0xd61   :  { %v2661_v30 = vpop.eup %2660 }
 0xd62   :  { %v1157_v31 = vadd.f32 1.0, %v2661_v30 }
 0xd64   :  { %2662 = vrcp.f32 %v1157_v31 }
 0xd6e   :  { %v2663_v32 = vpop.eup %2662 }
 0xd6f   :  { %v1164_v39 = vmul.f32 %v2663_v32, %v1162_v38 }
 0xdd2   :  { %v1167_v34 = vpop.permute.xlu0 %1166 }
 0xdd3   :  { %v1169_v37 = vmul.f32 %v2663_v32, %v1167_v34 }
 0xdd5   :  { %1171 = vrot.lane.b32.xlu1 %v1169_v37, %s2799_s7 }
 0xe47   :  { %v1172_v40 = vpop.permute.xlu1 %1171 }
 0xe48   :  { %v1174_v41 = vadd.f32 %v1172_v40, %v1164_v39 }
 0xe4a   :  { %2664 = vtanh.f32 %v1174_v41  ;;  %v1270_v60 = vrot.slane %v1174_v41, 6 }
 0xe54   :  { %v2665_v42 = vpop.eup %2664 }
 0xe55   :  { %1177 = vrot.lane.b32.xlu0 %v2665_v42, %s2795_s6 }
 0xec7   :  { %v1178_v43 = vpop.permute.xlu0 %1177 }
 0xec8   :  { %v1180_v44 = vmul.f32 %v2663_v32, %v1178_v43 }
 0xeca   :  { %v1182_v45 = vrot.slane %v1180_v44, 2  ;;  %v1825_v4 = vsel %vm220_vm2, %v2940_v21, %v1180_v44 }
 0xecc   :  { %1183 = vrot.lane.b32.xlu1 %v1182_v45, %s2799_s7 }
 0xf3e   :  { %v1184_v47 = vpop.permute.xlu1 %1183 }
 0xf3f   :  { %2434 = vmatmul.mubr.msk.f32.vlgmr.msra.gmra.mrb[10].mxu0 %vm86_vm0, %v1184_v47 }
 0xf40   :  { %2582 = vmatpush3.bf16.msra.mxu0 %v2903_v55  ;;  %2455 = vmatprep.mubr.msk.f32.mxu0 %vm2797_vm4, %v2798_v63 }
 0xf41   :  { %2583 = vmatprep.subr.bf16.mxu0 %v2796_v62 }
 0xf44   :  { %2585 = vmatpush3.bf16.msra.mxu0 %v2907_v59 }
 0xf45   :  { %2592 = vmatprep.subr.bf16.mxu0 %v2796_v62 }
0x1012   :  { %v1253_v48 = vpop.f32.mrb[10].mxu0 }
0x1013   :  { %v1258_v49 = vrot.slane %v1253_v48, 4  ;;  %v2435_v50 = vpop.f32.mrb[11].mxu0 }
0x1015   :  { %v1260_v51 = vadd.f32 %v1258_v49, %v2931_v5 }
0x1017   :  { %v1261_v36 = vadd.f32 %v2933_v6, %v1260_v51 }
0x1019   :  { %2666 = vtanh.f32 %v1261_v36  ;;  %v2207_v53 = vmul.f32 -1.442695, %v1261_v36 }
0x101b   :  { %2668 = vpow2.f32 %v2207_v53 }
0x1023   :  { %v2667_v52 = vpop.eup %2666 }
0x1024   :  { %1274 = vrot.lane.b32.xlu0 %v2667_v52, %s2795_s6 }
0x1025   :  { %v2669_v54 = vpop.eup %2668 }
0x1026   :  { %v1265_v56 = vadd.f32 1.0, %v2669_v54 }
0x1028   :  { %2670 = vrcp.f32 %v1265_v56 }
0x1032   :  { %v2671_v57 = vpop.eup %2670 }
0x1033   :  { %v1272_v61 = vmul.f32 %v2671_v57, %v1270_v60 }
0x1096   :  { %v1275_v58 = vpop.permute.xlu0 %1274 }
0x1097   :  { %v1277_v46 = vmul.f32 %v2671_v57, %v1275_v58 }
0x1099   :  { %1279 = vrot.lane.b32.xlu1 %v1277_v46, %s2799_s7 }
0x110b   :  { %v1280_v0 = vpop.permute.xlu1 %1279 }
0x110c   :  { %v1282_v1 = vadd.f32 %v1280_v0, %v1272_v61 }
0x110e   :  { %2672 = vtanh.f32 %v1282_v1  ;;  %v1378_v22 = vrot.slane %v1282_v1, 6 }
0x1118   :  { %v2673_v2 = vpop.eup %2672 }
0x1119   :  { %1285 = vrot.lane.b32.xlu0 %v2673_v2, %s2795_s6 }
0x118b   :  { %v1286_v33 = vpop.permute.xlu0 %1285 }
0x118c   :  { %v1288_v3 = vmul.f32 %v2671_v57, %v1286_v33 }
0x118e   :  { %v1290_v7 = vrot.slane %v1288_v3, 4  ;;  %v1826_v8 = vsel %vm572_vm6, %v1825_v4, %v1288_v3 }
0x1190   :  { %1291 = vrot.lane.b32.xlu1 %v1290_v7, %s2799_s7 }
0x1202   :  { %v1292_v9 = vpop.permute.xlu1 %1291 }
0x1203   :  { %2445 = vmatmul.mubr.msk.f32.vlgmr.msra.gmra.mrb[14].mxu1 %vm86_vm0, %v1292_v9 }
0x1204   :  { %2588 = vmatpush3.bf16.msra.mxu1 %v2903_v55  ;;  %2466 = vmatprep.mubr.msk.f32.mxu1 %vm2797_vm4, %v2798_v63 }
0x1205   :  { %2589 = vmatprep.subr.bf16.mxu1 %v2796_v62 }
0x1208   :  { %2591 = vmatpush3.bf16.msra.mxu1 %v2907_v59 }
0x1209   :  { %2598 = vmatprep.subr.bf16.mxu1 %v2796_v62 }
0x12d6   :  { %v1361_v10 = vpop.f32.mrb[14].mxu1 }
0x12d7   :  { %v1366_v11 = vrot.slane %v1361_v10, 2  ;;  %v2446_v12 = vpop.f32.mrb[15].mxu1 }
0x12d9   :  { %v1368_v13 = vadd.f32 %v1366_v11, %v2931_v5 }
0x12db   :  { %v1369_v14 = vadd.f32 %v2933_v6, %v1368_v13 }
0x12dd   :  { %2674 = vtanh.f32 %v1369_v14  ;;  %v2209_v16 = vmul.f32 -1.442695, %v1369_v14 }
0x12df   :  { %2676 = vpow2.f32 %v2209_v16 }
0x12e7   :  { %v2675_v15 = vpop.eup %2674 }
0x12e8   :  { %1382 = vrot.lane.b32.xlu0 %v2675_v15, %s2795_s6 }
0x12e9   :  { %v2677_v17 = vpop.eup %2676 }
0x12ea   :  { %v1373_v18 = vadd.f32 1.0, %v2677_v17 }
0x12ec   :  { %2678 = vrcp.f32 %v1373_v18 }
0x12f6   :  { %v2679_v19 = vpop.eup %2678 }
0x12f7   :  { %v1380_v23 = vmul.f32 %v2679_v19, %v1378_v22 }
0x135a   :  { %v1383_v20 = vpop.permute.xlu0 %1382 }
0x135b   :  { %v1385_v21 = vmul.f32 %v2679_v19, %v1383_v20 }
0x135d   :  { %1387 = vrot.lane.b32.xlu1 %v1385_v21, %s2799_s7 }
0x13cf   :  { %v1388_v24 = vpop.permute.xlu1 %1387 }
0x13d0   :  { %v1390_v5 = vadd.f32 %v1388_v24, %v1380_v23 }
0x13d2   :  { %2680 = vtanh.f32 %v1390_v5  ;;  %v1483_v45 = vrot.slane %v1390_v5, 6 }
0x13dc   :  { %v2681_v25 = vpop.eup %2680 }
0x13dd   :  { %1393 = vrot.lane.b32.xlu0 %v2681_v25, %s2795_s6 }
0x144f   :  { %v1394_v26 = vpop.permute.xlu0 %1393 }
0x1450   :  { %v1396_v27 = vmul.f32 %v2679_v19, %v1394_v26 }
0x1452   :  { %v1398_v28 = vrot.slane %v1396_v27, 6  ;;  %v2986_v29 = vsel %vm1827_vm7, %v1826_v8, %v1396_v27 }
0x1454   :  { %1399 = vrot.lane.b32.xlu1 %v1398_v28, %s2799_s7 }
0x14c6   :  { %v1400_v30 = vpop.permute.xlu1 %1399 }
0x14c7   :  { %2456 = vmatmul.mubr.msk.f32.vlgmr.msra.gmra.mrb[12].mxu0 %vm86_vm0, %v1400_v30 }
0x14c8   :  { %2594 = vmatpush3.bf16.msra.mxu0 %v2903_v55  ;;  %2477 = vmatprep.mubr.msk.f32.mxu0 %vm2797_vm4, %v2798_v63 }
0x14c9   :  { %2595 = vmatprep.subr.bf16.mxu0 %v2796_v62 }
0x14cc   :  { %2597 = vmatpush3.bf16.msra.mxu0 %v2907_v59 }
0x159a   :  { %v1469_v31 = vpop.f32.mrb[12].mxu0 }
0x159b   :  { %v1473_v32 = vadd.f32 %v1469_v31, %v2929_v35  ;;  %v2457_v34 = vpop.f32.mrb[13].mxu0 }
0x159d   :  { %v1474_v37 = vadd.f32 %v2933_v6, %v1473_v32 }
0x159f   :  { %2682 = vtanh.f32 %v1474_v37  ;;  %v2211_v39 = vmul.f32 -1.442695, %v1474_v37 }
0x15a1   :  { %2684 = vpow2.f32 %v2211_v39 }
0x15a9   :  { %v2683_v38 = vpop.eup %2682 }
0x15aa   :  { %1487 = vrot.lane.b32.xlu0 %v2683_v38, %s2795_s6 }
0x15ab   :  { %v2685_v40 = vpop.eup %2684 }
0x15ac   :  { %v1478_v41 = vadd.f32 1.0, %v2685_v40 }
0x15ae   :  { %2686 = vrcp.f32 %v1478_v41 }
0x15b8   :  { %v2687_v42 = vpop.eup %2686 }
0x15b9   :  { %v1485_v47 = vmul.f32 %v2687_v42, %v1483_v45 }
0x161c   :  { %v1488_v43 = vpop.permute.xlu0 %1487 }
0x161d   :  { %v1490_v44 = vmul.f32 %v2687_v42, %v1488_v43 }
0x161f   :  { %1492 = vrot.lane.b32.xlu1 %v1490_v44, %s2799_s7 }
0x1691   :  { %v1493_v48 = vpop.permute.xlu1 %1492 }
0x1692   :  { %v1495_v49 = vadd.f32 %v1493_v48, %v1485_v47 }
0x1694   :  { %2688 = vtanh.f32 %v1495_v49 }
0x169e   :  { %v2689_v50 = vpop.eup %2688 }
0x169f   :  { %1498 = vrot.lane.b32.xlu0 %v2689_v50, %s2795_s6 }
0x1711   :  { %v1499_v51 = vpop.permute.xlu0 %1498 }
0x1712   :  { %v3000_v36 = vmul.f32 %v2687_v42, %v1499_v51 }
0x1714   :  { %1503 = vrot.lane.b32.xlu1 %v3000_v36, %s2799_s7 }
0x1786   :  { %v1504_v52 = vpop.permute.xlu1 %1503 }
0x1787   :  { %2467 = vmatmul.mubr.msk.f32.vlgmr.msra.gmra.mrb[16].mxu1 %vm86_vm0, %v1504_v52 }
0x1788   :  { %2600 = vmatpush3.bf16.msra.mxu1 %v2903_v55  ;;  %2488 = vmatprep.mubr.msk.f32.mxu1 %vm2797_vm4, %v2798_v63 }
0x1789   :  { %2601 = vmatprep.subr.bf16.mxu1 %v2796_v62 }
0x178c   :  { %2603 = vmatpush3.bf16.msra.mxu1 %v2907_v59  ;;  %v1590_v59 = vrot.slane %v1495_v49, 6 }
0x185a   :  { %v1573_v53 = vpop.f32.mrb[16].mxu1 }
0x185b   :  { %v1578_v54 = vrot.slane %v1573_v53, 6  ;;  %v2468_v56 = vpop.f32.mrb[17].mxu1 }
0x185d   :  { %v1580_v57 = vadd.f32 %v1578_v54, %v2929_v35 }
0x185f   :  { %v1581_v58 = vadd.f32 %v2933_v6, %v1580_v57 }
0x1861   :  { %2690 = vtanh.f32 %v1581_v58  ;;  %v2213_v60 = vmul.f32 -1.442695, %v1581_v58 }
0x1863   :  { %2692 = vpow2.f32 %v2213_v60 }
0x186b   :  { %v2691_v46 = vpop.eup %2690 }
0x186c   :  { %1594 = vrot.lane.b32.xlu0 %v2691_v46, %s2795_s6 }
0x186d   :  { %v2693_v55 = vpop.eup %2692 }
0x186e   :  { %v1585_v61 = vadd.f32 1.0, %v2693_v55 }
0x1870   :  { %2694 = vrcp.f32 %v1585_v61 }
0x187a   :  { %v2695_v0 = vpop.eup %2694 }
0x187b   :  { %v1592_v33 = vmul.f32 %v2695_v0, %v1590_v59 }
0x18de   :  { %v1595_v1 = vpop.permute.xlu0 %1594 }
0x18df   :  { %v1597_v2 = vmul.f32 %v2695_v0, %v1595_v1 }
0x18e1   :  { %1599 = vrot.lane.b32.xlu1 %v1597_v2, %s2799_s7 }
0x1953   :  { %v1600_v3 = vpop.permute.xlu1 %1599 }
0x1954   :  { %v1602_v4 = vadd.f32 %v1600_v3, %v1592_v33 }
0x1956   :  { %2696 = vtanh.f32 %v1602_v4  ;;  %v1698_v24 = vrot.slane %v1602_v4, 6 }
0x1960   :  { %v2697_v7 = vpop.eup %2696 }
0x1961   :  { %1605 = vrot.lane.b32.xlu0 %v2697_v7, %s2795_s6 }
0x19d3   :  { %v1606_v8 = vpop.permute.xlu0 %1605 }
0x19d4   :  { %v1608_v9 = vmul.f32 %v2695_v0, %v1606_v8  ;;  %v2219_v8 = vld [vmem:[#allocation5 + $0xfe] ss:$0 sm:$0xff] }
0x19d6   :  { %v1610_v10 = vrot.slane %v1608_v9, 2  ;;  %v1829_v31 = vsel %vm220_vm2, %v3000_v36, %v1608_v9 }
0x19d8   :  { %1611 = vrot.lane.b32.xlu1 %v1610_v10, %s2799_s7 }
0x1a4a   :  { %v1612_v11 = vpop.permute.xlu1 %1611 }
0x1a4b   :  { %2478 = vmatmul.mubr.msk.f32.vlgmr.msra.gmra.mrb[14].mxu0 %vm86_vm0, %v1612_v11 }
0x1b1e   :  { %v1681_v12 = vpop.f32.mrb[14].mxu0 }
0x1b1f   :  { %v1686_v13 = vrot.slane %v1681_v12, 4  ;;  %v2479_v14 = vpop.f32.mrb[15].mxu0 }
0x1b20   :  { %v58_v14 = vld [vmem:[#allocation5 + $0x80] sm:$0xff] }
0x1b21   :  { %v1688_v15 = vadd.f32 %v1686_v13, %v2929_v35 }
0x1b23   :  { %v1689_v16 = vadd.f32 %v2933_v6, %v1688_v15  ;;  %v59_v15 = vld [vmem:[#allocation5 + $0x88] sm:$0xff] }
0x1b25   :  { %2698 = vtanh.f32 %v1689_v16  ;;  %v2215_v18 = vmul.f32 -1.442695, %v1689_v16  ;;  %v60_v16 = vld [vmem:[#allocation5 + $0x90] sm:$0xff] }
0x1b27   :  { %2700 = vpow2.f32 %v2215_v18  ;;  %v61_v18 = vld [vmem:[#allocation5 + $0x98] sm:$0xff] }
0x1b2f   :  { %v2699_v17 = vpop.eup %2698 }
0x1b30   :  { %1702 = vrot.lane.b32.xlu0 %v2699_v17, %s2795_s6  ;;  %v2604_v17 = vpack.c.bf16 %v59_v15, %v58_v14 }
0x1b31   :  { %v2701_v19 = vpop.eup %2700 }
0x1b32   :  { %v1693_v20 = vadd.f32 1.0, %v2701_v19  ;;  %v2608_v19 = vpack.c.bf16 %v61_v18, %v60_v16  ;;  %2605 = vmatprep.subr.bf16.mxu0 %v2604_v17 }
0x1b33   :  { %2607 = vmatpush3.bf16.msra.mxu0 %v2604_v17 }
0x1b34   :  { %2702 = vrcp.f32 %v1693_v20  ;;  %2609 = vmatprep.subr.bf16.mxu0 %v2608_v19 }
0x1b37   :  { %2611 = vmatpush3.bf16.msra.mxu0 %v2608_v19 }
0x1b38   :  { %2620 = vmatprep.subr.bf16.mxu0 %v2796_v62  ;;  %v64_v62 = vld [vmem:[#allocation5 + $0xb0] sm:$0xff] }
0x1b3e   :  { %v2703_v21 = vpop.eup %2702 }
0x1b3f   :  { %v1700_v5 = vmul.f32 %v2703_v21, %v1698_v24 }
0x1ba2   :  { %v1703_v22 = vpop.permute.xlu0 %1702 }
0x1ba3   :  { %v1705_v23 = vmul.f32 %v2703_v21, %v1703_v22 }
0x1ba5   :  { %1707 = vrot.lane.b32.xlu1 %v1705_v23, %s2799_s7 }
0x1c17   :  { %v1708_v25 = vpop.permute.xlu1 %1707 }
0x1c18   :  { %v1710_v26 = vadd.f32 %v1708_v25, %v1700_v5 }
0x1c1a   :  { %2704 = vtanh.f32 %v1710_v26 }
0x1c24   :  { %v2705_v27 = vpop.eup %2704 }
0x1c25   :  { %1713 = vrot.lane.b32.xlu0 %v2705_v27, %s2795_s6 }
0x1c97   :  { %v1714_v28 = vpop.permute.xlu0 %1713 }
0x1c98   :  { %v1716_v30 = vmul.f32 %v2703_v21, %v1714_v28  ;;  %v62_v28 = vld [vmem:[#allocation5 + $0xa0] sm:$0xff] }
0x1c9a   :  { %v1718_v32 = vrot.slane %v1716_v30, 4  ;;  %v1830_v34 = vsel %vm572_vm6, %v1829_v31, %v1716_v30  ;;  %v63_v30 = vld [vmem:[#allocation5 + $0xa8] sm:$0xff] }
0x1c9b   :  { %v2612_v31 = vpack.c.bf16 %v63_v30, %v62_v28 }
0x1c9c   :  { %1719 = vrot.lane.b32.xlu1 %v1718_v32, %s2799_s7 }
0x1c9d   :  { %2613 = vmatprep.subr.bf16.mxu1 %v2612_v31 }
0x1d0e   :  { %v1720_v37 = vpop.permute.xlu1 %1719 }
0x1d0f   :  { %2489 = vmatmul.mubr.msk.f32.vlgmr.msra.gmra.mrb[18].mxu1 %vm86_vm0, %v1720_v37 }
0x1d10   :  { %2615 = vmatpush3.bf16.msra.mxu1 %v2612_v31 }
0x1de2   :  { %v1789_v38 = vpop.f32.mrb[18].mxu1 }
0x1de3   :  { %v1794_v39 = vrot.slane %v1789_v38, 2  ;;  %v2490_v40 = vpop.f32.mrb[19].mxu1 }
0x1de5   :  { %v1796_v41 = vadd.f32 %v1794_v39, %v2929_v35  ;;  %v1806_v35 = vrot.slane %v1710_v26, 6 }
0x1de7   :  { %v1797_v42 = vadd.f32 %v2933_v6, %v1796_v41  ;;  %v65_v41 = vld [vmem:[#allocation5 + $0xb8] sm:$0xff] }
0x1de9   :  { %2706 = vtanh.f32 %v1797_v42  ;;  %v2217_v44 = vmul.f32 -1.442695, %v1797_v42  ;;  %v2616_v42 = vpack.c.bf16 %v65_v41, %v64_v62 }
0x1deb   :  { %2708 = vpow2.f32 %v2217_v44  ;;  %2617 = vmatprep.subr.bf16.mxu1 %v2616_v42 }
0x1dec   :  { %2619 = vmatpush3.bf16.msra.mxu1 %v2616_v42 }
0x1df3   :  { %v2707_v43 = vpop.eup %2706 }
0x1df4   :  { %1810 = vrot.lane.b32.xlu0 %v2707_v43, %s2795_s6  ;;  %v2220_v43 = vld [vmem:[#allocation5 + $0xff] ss:$0 sm:$0xff] }
0x1df5   :  { %v2709_v45 = vpop.eup %2708 }
0x1df6   :  { %v1801_v47 = vadd.f32 1.0, %v2709_v45 }
0x1df8   :  { %2710 = vrcp.f32 %v1801_v47 }
0x1e02   :  { %v2711_v48 = vpop.eup %2710 }
0x1e03   :  { %v1808_v51 = vmul.f32 %v2711_v48, %v1806_v35  ;;  %v85_v35 = vld [vmem:[#allocation5 + $0x101] sm:$0x1] }
0x1e66   :  { %v1811_v49 = vpop.permute.xlu0 %1810 }
0x1e67   :  { %v1813_v50 = vmul.f32 %v2711_v48, %v1811_v49 }
0x1e69   :  { %1815 = vrot.lane.b32.xlu1 %v1813_v50, %s2799_s7 }
0x1e6d   :  { %1834 = vrot.lane.b32.xlu1 %v2986_v29, %s2799_s7 }
0x1edb   :  { %v1816_v6 = vpop.permute.xlu1 %1815 }
0x1edc   :  { %v1818_v36 = vadd.f32 %v1816_v6, %v1808_v51  ;;  %v2800_v51 = vmov 0  }
0x1edd   :  { %2636 = vset.pattern.permute.xlu1 %v2800_v51  ;;  %2637 = vset.pattern.permute.xlu0 %v2800_v51 }
0x1ede   :  { %2712 = vtanh.f32 %v1818_v36 }
0x1edf   :  { %v1835_v52 = vpop.permute.xlu1 %1834 }
0x1ee0   :  { %v1840_v53 = vsel %vm86_vm0, %v1835_v52, 0.0 }
0x1ee1   :  { %1841 = vadd.xlane.f32.xlu1 %v1840_v53 }
0x1ee8   :  { %v2713_v54 = vpop.eup %2712 }
0x1ee9   :  { %1821 = vrot.lane.b32.xlu0 %v2713_v54, %s2795_s6 }
0x1f5b   :  { %v1822_v56 = vpop.permute.xlu0 %1821 }
0x1f5c   :  { %v1824_v57 = vmul.f32 %v2711_v48, %v1822_v56 }
0x1f5e   :  { %v1831_v58 = vsel %vm1827_vm7, %v1830_v34, %v1824_v57 }
0x1f5f   :  { %1836 = vrot.lane.b32.xlu0 %v1831_v58, %s2799_s7 }
0x1f6e   :  { %v1842_v55 = vpop.xlane.xlu1 %1841 }
0x1f6f   :  { %v1846_v61 = vmul.f32 0.03125, %v1842_v55 }
0x1f71   :  { %v1848_v0 = vsub.f32 %v2986_v29, %v1846_v61  ;;  %v2218_v29 = vld [vmem:[#allocation5 + $0xfd] ss:$0 sm:$0xff] }
0x1f73   :  { %v1850_v1 = vmul.f32 %v1848_v0, %v1848_v0 }
0x1fd1   :  { %v1837_v46 = vpop.permute.xlu0 %1836 }
0x1fd2   :  { %v1843_v60 = vsel %vm86_vm0, %v1837_v46, 0.0 }
0x1fd3   :  { %1844 = vadd.xlane.f32.xlu0 %v1843_v60 }
0x1fe9   :  { %1854 = vrot.lane.b32.xlu0 %v1850_v1, %s2799_s7 }
0x2060   :  { %v1845_v2 = vpop.xlane.xlu0 %1844 }
0x2061   :  { %v1847_v59 = vmul.f32 0.03125, %v1845_v2 }
0x2063   :  { %v1849_v33 = vsub.f32 %v1831_v58, %v1847_v59  ;;  %v74_v58 = vld [vmem:[#allocation5 + $0xf6] sm:$0x1] }
0x2064   :  { %v1855_v4 = vpop.permute.xlu0 %1854 }
0x2065   :  { %v1851_v3 = vmul.f32 %v1849_v33, %v1849_v33  ;;  %v1860_v7 = vsel %vm86_vm0, %v1855_v4, 0.0 }
0x2067   :  { %1856 = vrot.lane.b32.xlu1 %v1851_v3, %s2799_s7 }
0x208b   :  { %1861 = vadd.xlane.f32.xlu1 %v1860_v7 }
0x209c   :  { %1889 = vrot.lane.b32.xlu1 %v2219_v8, %s2794_s1 }
0x20d9   :  { %v1857_v9 = vpop.permute.xlu1 %1856 }
0x20da   :  { %v1863_v10 = vsel %vm86_vm0, %v1857_v9, 0.0 }
0x20db   :  { %1864 = vadd.xlane.f32.xlu0 %v1863_v10 }
0x20f1   :  { %1879 = vrot.lane.b32.xlu0 %v2218_v29, %s2794_s1 }
0x2118   :  { %v1862_v11 = vpop.xlane.xlu1 %1861 }
0x2119   :  { %v1866_v12 = vmul.f32 0.03125, %v1862_v11 }
0x211b   :  { %v1868_v13 = vadd.f32 1e-05, %v1866_v12 }
0x211c   :  { %v1890_v25 = vpop.permute.xlu1 %1889 }
0x211d   :  { %2714 = vrsqrt.f32 %v1868_v13 }
0x2127   :  { %v2715_v20 = vpop.eup %2714 }
0x2128   :  { %v1872_v24 = vmul.f32 %v2715_v20, %v1848_v0 }
0x2168   :  { %v1865_v21 = vpop.xlane.xlu0 %1864 }
0x2169   :  { %v1867_v22 = vmul.f32 0.03125, %v1865_v21 }
0x216b   :  { %v1869_v23 = vadd.f32 1e-05, %v1867_v22 }
0x216c   :  { %v1880_v5 = vpop.permute.xlu0 %1879 }
0x216d   :  { %2716 = vrsqrt.f32 %v1869_v23  ;;  %v1882_v26 = vmul.f32 %v1880_v5, %v1872_v24 }
0x216f   :  { %v1892_v27 = vadd.f32 %v1890_v25, %v1882_v26 }
0x2171   :  { %1900 = vrot.lane.b32.xlu1 %v1892_v27, %s2799_s7 }
0x2175   :  { %2076 = vperm.xlu1 %2636, %v85_v35  }
0x2177   :  { %v2717_v32 = vpop.eup %2716 }
0x2178   :  { %v1873_v34 = vmul.f32 %v2717_v32, %v1849_v33 }
0x217a   :  { %v1883_v37 = vmul.f32 %v1880_v5, %v1873_v34 }
0x217c   :  { %v1893_v38 = vadd.f32 %v1890_v25, %v1883_v37 }
0x217e   :  { %1902 = vrot.lane.b32.xlu0 %v1893_v38, %s2799_s7 }
0x21e3   :  { %v1901_v39 = vpop.permute.xlu1 %1900 }
0x21e4   :  { %2499 = vmatprep.mubr.msk.f32.mxu0 %vm86_vm0, %v1901_v39 }
0x21f0   :  { %v1903_v40 = vpop.permute.xlu0 %1902 }
0x21f1   :  { %2500 = vmatmul.mubr.msk.f32.vlgmr.msra.gmra.mrb[16].mxu0 %vm86_vm0, %v1903_v40 }
0x21f2   :  { %2517 = vmatprep.mubr.msk.f32.mxu0 %vm2797_vm4, %v2798_v63  ;;  %v2223_v63 = vld [vmem:[#allocation5 + $0x100] ss:$0 sm:$0xff] }
0x21f4   :  { %v2077_v46 = vpop.permute.xlu1 %2076 }
0x22c4   :  { %v2501_v44 = vpop.f32.mrb[16].mxu0 }
0x22c5   :  { %v1980_v45 = vadd.f32 %v2501_v44, %v2220_v43  ;;  %v1974_v47 = vpop.f32.mrb[17].mxu0 }
0x22c6   :  { %v1975_v48 = vadd.f32 %v2220_v43, %v1974_v47 }
0x22c7   :  { %v1984_v50 = vmax.f32 %v1980_v45, 0.0 }
0x22c8   :  { %v1983_v49 = vmax.f32 %v1975_v48, 0.0 }
0x22ca   :  { %2510 = vmatprep.mubr.msk.f32.mxu1 %vm86_vm0, %v1983_v49 }
0x22cb   :  { %2511 = vmatmul.mubr.msk.f32.vlgmr.msra.gmra.mrb[20].mxu1 %vm86_vm0, %v1984_v50 }
0x239e   :  { %v2512_v6 = vpop.f32.mrb[20].mxu1 }
0x239f   :  { %v2067_v36 = vadd.f32 %v2512_v6, %v2223_v63  ;;  %v2061_v52 = vpop.f32.mrb[21].mxu1 }
0x23a0   :  { %v2062_v53 = vadd.f32 %v2223_v63, %v2061_v52 }
0x23a1   :  { %v2073_v54 = vadd.f32 %v2067_v36, %v1903_v40 }
0x23a2   :  { %v2072_v56 = vadd.f32 %v2062_v53, %v1901_v39 }
0x23a4   :  { %v2621_v57 = vpack.c.bf16 %v2073_v54, %v2072_v56 }
0x23a6   :  { %2623 = vmatpush3.bf16.xpose.msk.msra.mxu0 %vm2622_vm8, %v2621_v57 }
0x23ad   :  { %2518 = vmatmul.mubr.msk.f32.vlgmr.msra.gmra.mrb[18].mxu0 %vm86_vm0, %v74_v58 }
0x2480   :  { %v2154_v60 = vpop.f32.mrb[18].mxu0 }
0x2481   :  { %v2155_v55 = vadd.f32 %v2154_v60, %v2077_v46  ;;  %v2519_v61 = vpop.f32.mrb[19].mxu0 }
0x2483   :  { %2159 = vst.msk [vmem:[#allocation7] sm:$0x1] %vm2158_vm9, %v2155_v55 }
0x2484   :  { %2773 = shalt.err (!%p2770_p6)
}
0x2485   :  { %s2774_s14 = scalar_lea.hbm %s3071_s2, 16 }
0x2486   :  { %p2775_p7 = scmp.ne.s32.totalorder %s3071_s2, %s2774_s14  ;;  %p2778_p8 = scmp.lt.u32.totalorder %s2774_s14, %s3071_s2 }
0x2488   :  { %p2780_p9 = pnand %p2778_p8, %p2775_p7 }
0x248a   :  { %2783 = shalt.err (!%p2780_p9)
}
0x248b   :  { %2169 = dma.vmem_to_hbm [thread:$0]  %s2167_s9, 16, %s3071_s2, [#allocation4]  }
0x248c   :  { %2788 = dma.done.wait [#allocation4], 16  }
0x248d   :  { %2789 = vsyncadd [#allocation4], 4294967280 }
0x248e   :  { %2173 = vsyncpa [#allocation3], 1 }
0x248f   :  { %2174 = vsyncpa [#allocation6], 1 }
0x2490   :  { %2175 = vsyncpa [#allocation4], 1 }

</bundles_post_ra>
